<compile_context>
chip_gen: v7x
topology: tpu7x:2x2x1
jax: 0.10.0
libtpu: 0.0.40
codegen_flags: <defaults>
</compile_context>

<pallas_src>
import functools
import math

import jax
import jax.numpy as jnp
from jax.experimental import pallas as pl
from jax.experimental.pallas import tpu as pltpu


# ---------------------------------------------------------------------------
# In-kernel helpers
# ---------------------------------------------------------------------------
def _layernorm(x, g, b, eps=1e-5):
    # x: (N, D), g/b: (1, D) — matches torch.nn.LayerNorm(d_model), eps=1e-5.
    mu = jnp.mean(x, axis=-1, keepdims=True)
    var = jnp.mean((x - mu) ** 2, axis=-1, keepdims=True)
    return (x - mu) * jax.lax.rsqrt(var + eps) * g + b


def _gelu_exact(x):
    # torch.nn.GELU() default is the exact (erf) formulation.
    return 0.5 * x * (1.0 + jax.lax.erf(x * (1.0 / math.sqrt(2.0))))


# ---------------------------------------------------------------------------
# Transformer block kernel: x -> x + Attn(LN1(x)) -> (+) MLP(LN2(.)) [-> LN]
# ---------------------------------------------------------------------------
def block_kernel(n_heads, apply_final_ln,
                 x_ref,
                 ln1g_ref, ln1b_ref,
                 wqkv_ref, bqkv_ref,
                 wproj_ref, bproj_ref,
                 ln2g_ref, ln2b_ref,
                 w1_ref, b1_ref,
                 w2_ref, b2_ref,
                 lnf_g_ref, lnf_b_ref,
                 o_ref):
    x = x_ref[0].astype(jnp.float32)          # (N, D) residual stream, f32 math
    N, D = x.shape
    nh = n_heads
    dh = D // nh

    # ---- multi-head self-attention (pre-norm) ----
    h = _layernorm(x, ln1g_ref[...], ln1b_ref[...])
    # Single fused-QKV matmul; the 1/sqrt(dh) scale is pre-folded into Wq/bq.
    qkv = jnp.dot(h.astype(jnp.bfloat16), wqkv_ref[...],
                  preferred_element_type=jnp.float32) + bqkv_ref[...]   # (N, 3D) f32
    qkv = qkv.astype(jnp.bfloat16)

    attn = jnp.zeros((N, D), jnp.float32)
    for hd in range(nh):                      # unrolled: nh is small and static
        q_h = qkv[:, 0 * D + hd * dh: 0 * D + (hd + 1) * dh]    # (N, dh) bf16
        k_h = qkv[:, 1 * D + hd * dh: 1 * D + (hd + 1) * dh]
        v_h = qkv[:, 2 * D + hd * dh: 2 * D + (hd + 1) * dh]
        # scores = q_h @ k_h^T (scale already folded into the weights)
        s = jax.lax.dot_general(q_h, k_h, (((1,), (1,)), ((), ())),
                                preferred_element_type=jnp.float32)     # (N, N)
        s = s - jnp.max(s, axis=-1, keepdims=True)
        p = jnp.exp(s)
        # EUP reciprocal (approx): ~2^-12 rel. error vs exact softmax division.
        p = p * pl.reciprocal(jnp.sum(p, axis=-1, keepdims=True), approx=True)
        o_h = jnp.dot(p.astype(jnp.bfloat16), v_h,
                      preferred_element_type=jnp.float32)               # (N, dh)
        # Blocked output projection: sum_h o_h @ Wproj[h*dh:(h+1)*dh, :]
        # (head-concat folded in; no (nh,N,D) intermediate is ever built).
        attn = attn + jnp.dot(o_h.astype(jnp.bfloat16),
                              wproj_ref[hd * dh:(hd + 1) * dh, :],
                              preferred_element_type=jnp.float32)
    x = x + attn + bproj_ref[...]             # residual (DropPath/dropout = identity)

    # ---- MLP (pre-norm) ----
    h2 = _layernorm(x, ln2g_ref[...], ln2b_ref[...])
    h2 = jnp.dot(h2.astype(jnp.bfloat16), w1_ref[...],
                 preferred_element_type=jnp.float32) + b1_ref[...]
    h2 = _gelu_exact(h2)
    h2 = jnp.dot(h2.astype(jnp.bfloat16), w2_ref[...],
                 preferred_element_type=jnp.float32) + b2_ref[...]
    x = x + h2                                # residual

    if apply_final_ln:                        # fused final LayerNorm (last layer only)
        x = _layernorm(x, lnf_g_ref[...], lnf_b_ref[...])

    o_ref[0] = x.astype(o_ref.dtype)


def final_ln_kernel(x_ref, g_ref, b_ref, o_ref):
    # Only used if there are zero transformer blocks.
    o_ref[0] = _layernorm(x_ref[0].astype(jnp.float32), g_ref[...], b_ref[...])


# ---------------------------------------------------------------------------
# pallas_call plumbing
# ---------------------------------------------------------------------------
def _vmem_limit_bytes():
    cap = 64 << 20                            # conservative fallback (v7x physical)
    try:
        cap = int(pltpu.get_tpu_info().vmem_capacity_bytes)
    except Exception:
        pass
    return int(min(96 << 20, (cap * 7) // 8))


_SB_SUPPORTED = None


def _single_buffer_supported():
    """One-time, lowering-only probe for pl.Buffered(1) on grid-invariant inputs."""
    global _SB_SUPPORTED
    if _SB_SUPPORTED is None:
        ok = hasattr(pl, "Buffered")
        if ok:
            try:
                def _k(x_ref, w_ref, o_ref):
                    o_ref[...] = x_ref[...] + w_ref[...]
                call = pl.pallas_call(
                    _k,
                    out_shape=jax.ShapeDtypeStruct((2, 8, 128), jnp.float32),
                    grid=(2,),
                    in_specs=[pl.BlockSpec((1, 8, 128), lambda i: (i, 0, 0)),
                              pl.BlockSpec((1, 8, 128), lambda i: (0, 0, 0),
                                           pipeline_mode=pl.Buffered(1))],
                    out_specs=pl.BlockSpec((1, 8, 128), lambda i: (i, 0, 0)))
                jax.jit(call).lower(jax.ShapeDtypeStruct((2, 8, 128), jnp.float32),
                                    jax.ShapeDtypeStruct((2, 8, 128), jnp.float32))
            except Exception:
                ok = False
        _SB_SUPPORTED = ok
    return _SB_SUPPORTED


def _const_spec(shape):
    return pl.BlockSpec(shape, lambda b: (0,) * len(shape))


def _weight_spec(shape):
    # Grid-invariant operands: single-buffer to avoid 2x VMEM reservation.
    if _single_buffer_supported():
        return pl.BlockSpec(shape, lambda b: (0,) * len(shape),
                            pipeline_mode=pl.Buffered(1))
    return _const_spec(shape)


def _make_block_call(B, N, D, F, nh, apply_final_ln, x_dtype, out_dtype):
    kernel = functools.partial(block_kernel, nh, apply_final_ln)
    w = _weight_spec

    # Advisory cost estimate so XLA can schedule/overlap adjacent layer calls.
    x_bytes = jnp.dtype(x_dtype).itemsize
    o_bytes = jnp.dtype(out_dtype).itemsize
    flops = int(B * (2 * N * D * 3 * D          # fused qkv
                     + 4 * N * N * D            # scores + attn @ v
                     + 2 * N * D * D            # out proj
                     + 4 * N * D * F))          # mlp
    transcendentals = int(B * (nh * N * N + N * F))
    weight_bytes = 2 * (3 * D * D + D * D + 2 * D * F)          # bf16 weights
    bytes_accessed = int(B * N * D * (x_bytes + o_bytes)
                         + weight_bytes + 4 * (3 * D + F + 10 * D))

    return pl.pallas_call(
        kernel,
        out_shape=jax.ShapeDtypeStruct((B, N, D), out_dtype),
        grid=(B,),
        in_specs=[
            pl.BlockSpec((1, N, D), lambda b: (b, 0, 0)),   # x (double-buffered)
            w((1, D)), w((1, D)),                           # ln1 gamma/beta
            w((D, 3 * D)), w((1, 3 * D)),                   # fused qkv (scale folded)
            w((D, D)), w((1, D)),                           # out proj
            w((1, D)), w((1, D)),                           # ln2 gamma/beta
            w((D, F)), w((1, F)),                           # mlp fc1
            w((F, D)), w((1, D)),                           # mlp fc2
            w((1, D)), w((1, D)),                           # final LN (last layer only)
        ],
        out_specs=pl.BlockSpec((1, N, D), lambda b: (b, 0, 0)),
        compiler_params=pltpu.CompilerParams(
            dimension_semantics=("parallel",),              # batch axis -> megacore
            vmem_limit_bytes=_vmem_limit_bytes()),
        cost_estimate=pl.CostEstimate(flops=flops,
                                      transcendentals=transcendentals,
                                      bytes_accessed=bytes_accessed),
    )


def run_block(x, blk, nh, norm_g, norm_b, apply_final_ln, out_dtype):
    B, N, D = x.shape
    F = blk["w1"].shape[1]
    call = _make_block_call(B, N, D, F, nh, apply_final_ln, x.dtype, out_dtype)
    return call(x,
                blk["ln1_g"], blk["ln1_b"],
                blk["wqkv"], blk["bqkv"],
                blk["wproj"], blk["bproj"],
                blk["ln2_g"], blk["ln2_b"],
                blk["w1"], blk["b1"],
                blk["w2"], blk["b2"],
                norm_g, norm_b)


def run_final_ln(x, g, b):
    # Only reached when n_layers == 0 (otherwise fused into the last block).
    B, N, D = x.shape
    return pl.pallas_call(
        final_ln_kernel,
        out_shape=jax.ShapeDtypeStruct((B, N, D), jnp.float32),
        grid=(B,),
        in_specs=[pl.BlockSpec((1, N, D), lambda b: (b, 0, 0)),
                  _const_spec((1, D)), _const_spec((1, D))],
        out_specs=pl.BlockSpec((1, N, D), lambda b: (b, 0, 0)),
        compiler_params=pltpu.CompilerParams(dimension_semantics=("parallel",)),
    )(x, g, b)


@functools.partial(jax.jit, static_argnames=("n_heads",))
def vision_transformer2_forward(im, params, *, n_heads):
    """im: (B, d_model, H, W) NCHW with H = W = grid_size. Returns (B, H*W, d_model) f32."""
    B, D, H, W = im.shape
    x = im + params["pos_embed"]                      # broadcast over batch
    # TODO(synk): nn.Dropout(0.1) / DropPath are identity here (inference-mode forward).
    x = x.reshape(B, D, H * W).transpose(0, 2, 1)     # (B, N, D) f32, matches permute(0,2,1)
    blocks = params["blocks"]
    if not blocks:
        return run_final_ln(x, params["norm_g"], params["norm_b"])
    # Carry the inter-layer residual stream in bf16 (activation traffic / VMEM);
    # in-kernel math is f32.  Numerics deviation vs the f32 PyTorch reference.
    x = x.astype(jnp.bfloat16)
    n_layers = len(blocks)
    for li, blk in enumerate(blocks):
        last = li == n_layers - 1
        x = run_block(x, blk, n_heads, params["norm_g"], params["norm_b"],
                      apply_final_ln=last,
                      out_dtype=jnp.float32 if last else jnp.bfloat16)
    return x


# ---------------------------------------------------------------------------
# Parameter init (canonical torch-like layout) + kernel-layout preparation
# ---------------------------------------------------------------------------
def init_params(key, grid_size, d_model, d_ff, n_layers, n_heads):
    # Mirrors init_weights: trunc-normal-ish linear weights std=0.02, zero biases,
    # LayerNorm weight=1 / bias=0.  Linear weights stored (in, out).
    keys = jax.random.split(key, 1 + 5 * n_layers)
    params = {
        "n_heads": n_heads,
        "pos_embed": 0.02 * jax.random.normal(
            keys[0], (1, d_model, grid_size, grid_size), jnp.float32),
        "norm_g": jnp.ones((1, d_model), jnp.float32),
        "norm_b": jnp.zeros((1, d_model), jnp.float32),
        "blocks": [],
    }
    for i in range(n_layers):
        k = keys[1 + 5 * i:1 + 5 * (i + 1)]
        blk = {
            "ln1_g": jnp.ones((1, d_model), jnp.float32),
            "ln1_b": jnp.zeros((1, d_model), jnp.float32),
            "wqkv": 0.02 * jax.random.normal(k[0], (d_model, 3 * d_model), jnp.float32),
            "bqkv": jnp.zeros((1, 3 * d_model), jnp.float32),
            "wproj": 0.02 * jax.random.normal(k[1], (d_model, d_model), jnp.float32),
            "bproj": jnp.zeros((1, d_model), jnp.float32),
            "ln2_g": jnp.ones((1, d_model), jnp.float32),
            "ln2_b": jnp.zeros((1, d_model), jnp.float32),
            "w1": 0.02 * jax.random.normal(k[2], (d_model, d_ff), jnp.float32),
            "b1": jnp.zeros((1, d_ff), jnp.float32),
            "w2": 0.02 * jax.random.normal(k[3], (d_ff, d_model), jnp.float32),
            "b2": jnp.zeros((1, d_model), jnp.float32),
        }
        params["blocks"].append(blk)
    return params


def prepare_params(params):
    """One-time host-side prep: fold 1/sqrt(dh) into Wq/bq, cast matmul weights to bf16."""
    nh = params["n_heads"]
    out = {"pos_embed": params["pos_embed"],
           "norm_g": params["norm_g"], "norm_b": params["norm_b"], "blocks": []}
    for blk in params["blocks"]:
        D = blk["wqkv"].shape[0]
        dh = D // nh
        scale = dh ** -0.5
        col_scale = jnp.concatenate([jnp.full((D,), scale, jnp.float32),
                                     jnp.ones((2 * D,), jnp.float32)])[None, :]
        out["blocks"].append({
            "ln1_g": blk["ln1_g"], "ln1_b": blk["ln1_b"],
            "wqkv": (blk["wqkv"] * col_scale).astype(jnp.bfloat16),
            "bqkv": blk["bqkv"] * col_scale,
            "wproj": blk["wproj"].astype(jnp.bfloat16), "bproj": blk["bproj"],
            "ln2_g": blk["ln2_g"], "ln2_b": blk["ln2_b"],
            "w1": blk["w1"].astype(jnp.bfloat16), "b1": blk["b1"],
            "w2": blk["w2"].astype(jnp.bfloat16), "b2": blk["b2"],
        })
    return out


if __name__ == "__main__":
    # Small shapes consistent with the module: input channels == d_model and
    # spatial size == grid_size (required by the direct pos_embed add).
    # N = grid_size**2 = 16 is a multiple of 8 (sublane-aligned).
    B, d_model, grid_size = 2, 32, 4
    n_heads, d_ff, n_layers = 4, 4 * 32, 2

    key = jax.random.PRNGKey(0)
    k_im, k_par = jax.random.split(key)
    im = jax.random.normal(k_im, (B, d_model, grid_size, grid_size), jnp.float32)
    params = prepare_params(init_params(k_par, grid_size, d_model, d_ff, n_layers, n_heads))

    _single_buffer_supported()                # one-time lowering-only probe (outside jit)
    out = vision_transformer2_forward(im, params, n_heads=n_heads)
    out = jax.block_until_ready(out)
    assert out.shape == (B, grid_size * grid_size, d_model), out.shape
    assert bool(jnp.all(jnp.isfinite(out)))
    print("KERNEL_OK")
</pallas_src>

<mosaic_0001>
module attributes {stable_mosaic.version = 11 : i64} {
  func.func @block_kernel(%arg0: i32, %arg1: memref<1x16x32xbf16, #tpu.memory_space<vmem>>, %arg2: memref<1x32xf32, #tpu.memory_space<vmem>>, %arg3: memref<1x32xf32, #tpu.memory_space<vmem>>, %arg4: memref<32x96xbf16, #tpu.memory_space<vmem>>, %arg5: memref<1x96xf32, #tpu.memory_space<vmem>>, %arg6: memref<32x32xbf16, #tpu.memory_space<vmem>>, %arg7: memref<1x32xf32, #tpu.memory_space<vmem>>, %arg8: memref<1x32xf32, #tpu.memory_space<vmem>>, %arg9: memref<1x32xf32, #tpu.memory_space<vmem>>, %arg10: memref<32x128xbf16, #tpu.memory_space<vmem>>, %arg11: memref<1x128xf32, #tpu.memory_space<vmem>>, %arg12: memref<128x32xbf16, #tpu.memory_space<vmem>>, %arg13: memref<1x32xf32, #tpu.memory_space<vmem>>, %arg14: memref<1x32xf32, #tpu.memory_space<vmem>>, %arg15: memref<1x32xf32, #tpu.memory_space<vmem>>, %arg16: memref<1x16x32xf32, #tpu.memory_space<vmem>>) attributes {dimension_semantics = [#tpu.dimension_semantics<parallel>], iteration_bounds = array<i64: 2>, scalar_prefetch = 0 : i64, scratch_operands = 0 : i64, tpu.core_type = #tpu.core_type<tc>, window_params = [{transform_indices = @transform_0, window_bounds = array<i64: 1, 16, 32>}, {pipeline_mode = #tpu.pipeline_mode<synchronous>, transform_indices = @transform_1, window_bounds = array<i64: 1, 32>}, {pipeline_mode = #tpu.pipeline_mode<synchronous>, transform_indices = @transform_2, window_bounds = array<i64: 1, 32>}, {pipeline_mode = #tpu.pipeline_mode<synchronous>, transform_indices = @transform_3, window_bounds = array<i64: 32, 96>}, {pipeline_mode = #tpu.pipeline_mode<synchronous>, transform_indices = @transform_4, window_bounds = array<i64: 1, 96>}, {pipeline_mode = #tpu.pipeline_mode<synchronous>, transform_indices = @transform_5, window_bounds = array<i64: 32, 32>}, {pipeline_mode = #tpu.pipeline_mode<synchronous>, transform_indices = @transform_6, window_bounds = array<i64: 1, 32>}, {pipeline_mode = #tpu.pipeline_mode<synchronous>, transform_indices = @transform_7, window_bounds = array<i64: 1, 32>}, {pipeline_mode = #tpu.pipeline_mode<synchronous>, transform_indices = @transform_8, window_bounds = array<i64: 1, 32>}, {pipeline_mode = #tpu.pipeline_mode<synchronous>, transform_indices = @transform_9, window_bounds = array<i64: 32, 128>}, {pipeline_mode = #tpu.pipeline_mode<synchronous>, transform_indices = @transform_10, window_bounds = array<i64: 1, 128>}, {pipeline_mode = #tpu.pipeline_mode<synchronous>, transform_indices = @transform_11, window_bounds = array<i64: 128, 32>}, {pipeline_mode = #tpu.pipeline_mode<synchronous>, transform_indices = @transform_12, window_bounds = array<i64: 1, 32>}, {pipeline_mode = #tpu.pipeline_mode<synchronous>, transform_indices = @transform_13, window_bounds = array<i64: 1, 32>}, {pipeline_mode = #tpu.pipeline_mode<synchronous>, transform_indices = @transform_14, window_bounds = array<i64: 1, 32>}, {transform_indices = @transform_15, window_bounds = array<i64: 1, 16, 32>}]} {
    %c0 = arith.constant 0 : index
    %c0_0 = arith.constant 0 : index
    %c0_1 = arith.constant 0 : index
    %0 = vector.load %arg1[%c0, %c0_0, %c0_1] : memref<1x16x32xbf16, #tpu.memory_space<vmem>>, vector<1x16x32xbf16>
    %1 = vector.shape_cast %0 : vector<1x16x32xbf16> to vector<16x32xbf16>
    %2 = arith.extf %1 : vector<16x32xbf16> to vector<16x32xf32>
    %c0_2 = arith.constant 0 : index
    %c0_3 = arith.constant 0 : index
    %3 = vector.load %arg2[%c0_2, %c0_3] : memref<1x32xf32, #tpu.memory_space<vmem>>, vector<1x32xf32>
    %c0_4 = arith.constant 0 : index
    %c0_5 = arith.constant 0 : index
    %4 = vector.load %arg3[%c0_4, %c0_5] : memref<1x32xf32, #tpu.memory_space<vmem>>, vector<1x32xf32>
    %cst = arith.constant dense<0.000000e+00> : vector<16xf32>
    %5 = vector.multi_reduction <add>, %2, %cst [1] : vector<16x32xf32> to vector<16xf32>
    %6 = vector.shape_cast %5 : vector<16xf32> to vector<16x1xf32>
    %cst_6 = arith.constant 3.200000e+01 : f32
    %7 = vector.broadcast %cst_6 : f32 to vector<16x1xf32>
    %8 = arith.divf %6, %7 : vector<16x1xf32>
    %9 = vector.broadcast %8 : vector<16x1xf32> to vector<16x32xf32>
    %10 = arith.subf %2, %9 : vector<16x32xf32>
    %11 = arith.mulf %10, %10 : vector<16x32xf32>
    %cst_7 = arith.constant dense<0.000000e+00> : vector<16xf32>
    %12 = vector.multi_reduction <add>, %11, %cst_7 [1] : vector<16x32xf32> to vector<16xf32>
    %13 = vector.shape_cast %12 : vector<16xf32> to vector<16x1xf32>
    %cst_8 = arith.constant 3.200000e+01 : f32
    %14 = vector.broadcast %cst_8 : f32 to vector<16x1xf32>
    %15 = arith.divf %13, %14 : vector<16x1xf32>
    %16 = vector.broadcast %8 : vector<16x1xf32> to vector<16x32xf32>
    %17 = arith.subf %2, %16 : vector<16x32xf32>
    %cst_9 = arith.constant 9.99999974E-6 : f32
    %18 = vector.broadcast %cst_9 : f32 to vector<16x1xf32>
    %19 = arith.addf %15, %18 : vector<16x1xf32>
    %20 = math.rsqrt %19 : vector<16x1xf32>
    %21 = vector.broadcast %20 : vector<16x1xf32> to vector<16x32xf32>
    %22 = arith.mulf %17, %21 : vector<16x32xf32>
    %23 = vector.broadcast %3 : vector<1x32xf32> to vector<16x32xf32>
    %24 = arith.mulf %22, %23 : vector<16x32xf32>
    %25 = vector.broadcast %4 : vector<1x32xf32> to vector<16x32xf32>
    %26 = arith.addf %24, %25 : vector<16x32xf32>
    %27 = arith.truncf %26 : vector<16x32xf32> to vector<16x32xbf16>
    %c0_10 = arith.constant 0 : index
    %c0_11 = arith.constant 0 : index
    %28 = vector.load %arg4[%c0_10, %c0_11] : memref<32x96xbf16, #tpu.memory_space<vmem>>, vector<32x96xbf16>
    %cst_12 = arith.constant dense<0.000000e+00> : vector<16x96xf32>
    %29 = tpu.matmul %27, %28, %cst_12 {dimension_numbers = #tpu.dot_dimension_numbers<[1], [0], [0], [1], [0, 0, 1, 1], [], []>} : vector<16x32xbf16>, vector<32x96xbf16>, vector<16x96xf32> -> vector<16x96xf32>
    %c0_13 = arith.constant 0 : index
    %c0_14 = arith.constant 0 : index
    %30 = vector.load %arg5[%c0_13, %c0_14] : memref<1x96xf32, #tpu.memory_space<vmem>>, vector<1x96xf32>
    %31 = vector.broadcast %30 : vector<1x96xf32> to vector<16x96xf32>
    %32 = arith.addf %29, %31 : vector<16x96xf32>
    %33 = arith.truncf %32 : vector<16x96xf32> to vector<16x96xbf16>
    %cst_15 = arith.constant 0.000000e+00 : f32
    %34 = vector.broadcast %cst_15 : f32 to vector<16x32xf32>
    %35 = vector.extract_strided_slice %33 {offsets = [0, 0], sizes = [16, 8], strides = [1, 1]} : vector<16x96xbf16> to vector<16x8xbf16>
    %36 = vector.extract_strided_slice %33 {offsets = [0, 32], sizes = [16, 8], strides = [1, 1]} : vector<16x96xbf16> to vector<16x8xbf16>
    %37 = vector.extract_strided_slice %33 {offsets = [0, 64], sizes = [16, 8], strides = [1, 1]} : vector<16x96xbf16> to vector<16x8xbf16>
    %cst_16 = arith.constant dense<0.000000e+00> : vector<16x16xf32>
    %38 = tpu.matmul %35, %36, %cst_16 {dimension_numbers = #tpu.dot_dimension_numbers<[1], [1], [0], [0], [0, 0, 1, 0], [], []>} : vector<16x8xbf16>, vector<16x8xbf16>, vector<16x16xf32> -> vector<16x16xf32>
    %cst_17 = arith.constant dense<0xFF800000> : vector<16xf32>
    %39 = vector.multi_reduction <maximumf>, %38, %cst_17 [1] : vector<16x16xf32> to vector<16xf32>
    %40 = vector.shape_cast %39 : vector<16xf32> to vector<16x1xf32>
    %41 = vector.broadcast %40 : vector<16x1xf32> to vector<16x16xf32>
    %42 = arith.subf %38, %41 : vector<16x16xf32>
    %43 = math.exp %42 : vector<16x16xf32>
    %cst_18 = arith.constant dense<0.000000e+00> : vector<16xf32>
    %44 = vector.multi_reduction <add>, %43, %cst_18 [1] : vector<16x16xf32> to vector<16xf32>
    %45 = vector.shape_cast %44 : vector<16xf32> to vector<16x1xf32>
    %46 = tpu.reciprocal %45 {approx = true} : vector<16x1xf32> -> vector<16x1xf32>
    %47 = vector.broadcast %46 : vector<16x1xf32> to vector<16x16xf32>
    %48 = arith.mulf %43, %47 : vector<16x16xf32>
    %49 = arith.truncf %48 : vector<16x16xf32> to vector<16x16xbf16>
    %cst_19 = arith.constant dense<0.000000e+00> : vector<16x8xf32>
    %50 = tpu.matmul %49, %37, %cst_19 {dimension_numbers = #tpu.dot_dimension_numbers<[1], [0], [0], [1], [0, 0, 1, 1], [], []>} : vector<16x16xbf16>, vector<16x8xbf16>, vector<16x8xf32> -> vector<16x8xf32>
    %51 = arith.truncf %50 : vector<16x8xf32> to vector<16x8xbf16>
    %c0_20 = arith.constant 0 : index
    %c0_21 = arith.constant 0 : index
    %52 = vector.load %arg6[%c0_20, %c0_21] : memref<32x32xbf16, #tpu.memory_space<vmem>>, vector<8x32xbf16>
    %cst_22 = arith.constant dense<0.000000e+00> : vector<16x32xf32>
    %53 = tpu.matmul %51, %52, %cst_22 {dimension_numbers = #tpu.dot_dimension_numbers<[1], [0], [0], [1], [0, 0, 1, 1], [], []>} : vector<16x8xbf16>, vector<8x32xbf16>, vector<16x32xf32> -> vector<16x32xf32>
    %54 = arith.addf %34, %53 : vector<16x32xf32>
    %55 = vector.extract_strided_slice %33 {offsets = [0, 8], sizes = [16, 8], strides = [1, 1]} : vector<16x96xbf16> to vector<16x8xbf16>
    %56 = vector.extract_strided_slice %33 {offsets = [0, 40], sizes = [16, 8], strides = [1, 1]} : vector<16x96xbf16> to vector<16x8xbf16>
    %57 = vector.extract_strided_slice %33 {offsets = [0, 72], sizes = [16, 8], strides = [1, 1]} : vector<16x96xbf16> to vector<16x8xbf16>
    %cst_23 = arith.constant dense<0.000000e+00> : vector<16x16xf32>
    %58 = tpu.matmul %55, %56, %cst_23 {dimension_numbers = #tpu.dot_dimension_numbers<[1], [1], [0], [0], [0, 0, 1, 0], [], []>} : vector<16x8xbf16>, vector<16x8xbf16>, vector<16x16xf32> -> vector<16x16xf32>
    %cst_24 = arith.constant dense<0xFF800000> : vector<16xf32>
    %59 = vector.multi_reduction <maximumf>, %58, %cst_24 [1] : vector<16x16xf32> to vector<16xf32>
    %60 = vector.shape_cast %59 : vector<16xf32> to vector<16x1xf32>
    %61 = vector.broadcast %60 : vector<16x1xf32> to vector<16x16xf32>
    %62 = arith.subf %58, %61 : vector<16x16xf32>
    %63 = math.exp %62 : vector<16x16xf32>
    %cst_25 = arith.constant dense<0.000000e+00> : vector<16xf32>
    %64 = vector.multi_reduction <add>, %63, %cst_25 [1] : vector<16x16xf32> to vector<16xf32>
    %65 = vector.shape_cast %64 : vector<16xf32> to vector<16x1xf32>
    %66 = tpu.reciprocal %65 {approx = true} : vector<16x1xf32> -> vector<16x1xf32>
    %67 = vector.broadcast %66 : vector<16x1xf32> to vector<16x16xf32>
    %68 = arith.mulf %63, %67 : vector<16x16xf32>
    %69 = arith.truncf %68 : vector<16x16xf32> to vector<16x16xbf16>
    %cst_26 = arith.constant dense<0.000000e+00> : vector<16x8xf32>
    %70 = tpu.matmul %69, %57, %cst_26 {dimension_numbers = #tpu.dot_dimension_numbers<[1], [0], [0], [1], [0, 0, 1, 1], [], []>} : vector<16x16xbf16>, vector<16x8xbf16>, vector<16x8xf32> -> vector<16x8xf32>
    %71 = arith.truncf %70 : vector<16x8xf32> to vector<16x8xbf16>
    %c8 = arith.constant 8 : index
    %c0_27 = arith.constant 0 : index
    %72 = vector.load %arg6[%c8, %c0_27] : memref<32x32xbf16, #tpu.memory_space<vmem>>, vector<8x32xbf16>
    %cst_28 = arith.constant dense<0.000000e+00> : vector<16x32xf32>
    %73 = tpu.matmul %71, %72, %cst_28 {dimension_numbers = #tpu.dot_dimension_numbers<[1], [0], [0], [1], [0, 0, 1, 1], [], []>} : vector<16x8xbf16>, vector<8x32xbf16>, vector<16x32xf32> -> vector<16x32xf32>
    %74 = arith.addf %54, %73 : vector<16x32xf32>
    %75 = vector.extract_strided_slice %33 {offsets = [0, 16], sizes = [16, 8], strides = [1, 1]} : vector<16x96xbf16> to vector<16x8xbf16>
    %76 = vector.extract_strided_slice %33 {offsets = [0, 48], sizes = [16, 8], strides = [1, 1]} : vector<16x96xbf16> to vector<16x8xbf16>
    %77 = vector.extract_strided_slice %33 {offsets = [0, 80], sizes = [16, 8], strides = [1, 1]} : vector<16x96xbf16> to vector<16x8xbf16>
    %cst_29 = arith.constant dense<0.000000e+00> : vector<16x16xf32>
    %78 = tpu.matmul %75, %76, %cst_29 {dimension_numbers = #tpu.dot_dimension_numbers<[1], [1], [0], [0], [0, 0, 1, 0], [], []>} : vector<16x8xbf16>, vector<16x8xbf16>, vector<16x16xf32> -> vector<16x16xf32>
    %cst_30 = arith.constant dense<0xFF800000> : vector<16xf32>
    %79 = vector.multi_reduction <maximumf>, %78, %cst_30 [1] : vector<16x16xf32> to vector<16xf32>
    %80 = vector.shape_cast %79 : vector<16xf32> to vector<16x1xf32>
    %81 = vector.broadcast %80 : vector<16x1xf32> to vector<16x16xf32>
    %82 = arith.subf %78, %81 : vector<16x16xf32>
    %83 = math.exp %82 : vector<16x16xf32>
    %cst_31 = arith.constant dense<0.000000e+00> : vector<16xf32>
    %84 = vector.multi_reduction <add>, %83, %cst_31 [1] : vector<16x16xf32> to vector<16xf32>
    %85 = vector.shape_cast %84 : vector<16xf32> to vector<16x1xf32>
    %86 = tpu.reciprocal %85 {approx = true} : vector<16x1xf32> -> vector<16x1xf32>
    %87 = vector.broadcast %86 : vector<16x1xf32> to vector<16x16xf32>
    %88 = arith.mulf %83, %87 : vector<16x16xf32>
    %89 = arith.truncf %88 : vector<16x16xf32> to vector<16x16xbf16>
    %cst_32 = arith.constant dense<0.000000e+00> : vector<16x8xf32>
    %90 = tpu.matmul %89, %77, %cst_32 {dimension_numbers = #tpu.dot_dimension_numbers<[1], [0], [0], [1], [0, 0, 1, 1], [], []>} : vector<16x16xbf16>, vector<16x8xbf16>, vector<16x8xf32> -> vector<16x8xf32>
    %91 = arith.truncf %90 : vector<16x8xf32> to vector<16x8xbf16>
    %c16 = arith.constant 16 : index
    %c0_33 = arith.constant 0 : index
    %92 = vector.load %arg6[%c16, %c0_33] : memref<32x32xbf16, #tpu.memory_space<vmem>>, vector<8x32xbf16>
    %cst_34 = arith.constant dense<0.000000e+00> : vector<16x32xf32>
    %93 = tpu.matmul %91, %92, %cst_34 {dimension_numbers = #tpu.dot_dimension_numbers<[1], [0], [0], [1], [0, 0, 1, 1], [], []>} : vector<16x8xbf16>, vector<8x32xbf16>, vector<16x32xf32> -> vector<16x32xf32>
    %94 = arith.addf %74, %93 : vector<16x32xf32>
    %95 = vector.extract_strided_slice %33 {offsets = [0, 24], sizes = [16, 8], strides = [1, 1]} : vector<16x96xbf16> to vector<16x8xbf16>
    %96 = vector.extract_strided_slice %33 {offsets = [0, 56], sizes = [16, 8], strides = [1, 1]} : vector<16x96xbf16> to vector<16x8xbf16>
    %97 = vector.extract_strided_slice %33 {offsets = [0, 88], sizes = [16, 8], strides = [1, 1]} : vector<16x96xbf16> to vector<16x8xbf16>
    %cst_35 = arith.constant dense<0.000000e+00> : vector<16x16xf32>
    %98 = tpu.matmul %95, %96, %cst_35 {dimension_numbers = #tpu.dot_dimension_numbers<[1], [1], [0], [0], [0, 0, 1, 0], [], []>} : vector<16x8xbf16>, vector<16x8xbf16>, vector<16x16xf32> -> vector<16x16xf32>
    %cst_36 = arith.constant dense<0xFF800000> : vector<16xf32>
    %99 = vector.multi_reduction <maximumf>, %98, %cst_36 [1] : vector<16x16xf32> to vector<16xf32>
    %100 = vector.shape_cast %99 : vector<16xf32> to vector<16x1xf32>
    %101 = vector.broadcast %100 : vector<16x1xf32> to vector<16x16xf32>
    %102 = arith.subf %98, %101 : vector<16x16xf32>
    %103 = math.exp %102 : vector<16x16xf32>
    %cst_37 = arith.constant dense<0.000000e+00> : vector<16xf32>
    %104 = vector.multi_reduction <add>, %103, %cst_37 [1] : vector<16x16xf32> to vector<16xf32>
    %105 = vector.shape_cast %104 : vector<16xf32> to vector<16x1xf32>
    %106 = tpu.reciprocal %105 {approx = true} : vector<16x1xf32> -> vector<16x1xf32>
    %107 = vector.broadcast %106 : vector<16x1xf32> to vector<16x16xf32>
    %108 = arith.mulf %103, %107 : vector<16x16xf32>
    %109 = arith.truncf %108 : vector<16x16xf32> to vector<16x16xbf16>
    %cst_38 = arith.constant dense<0.000000e+00> : vector<16x8xf32>
    %110 = tpu.matmul %109, %97, %cst_38 {dimension_numbers = #tpu.dot_dimension_numbers<[1], [0], [0], [1], [0, 0, 1, 1], [], []>} : vector<16x16xbf16>, vector<16x8xbf16>, vector<16x8xf32> -> vector<16x8xf32>
    %111 = arith.truncf %110 : vector<16x8xf32> to vector<16x8xbf16>
    %c24 = arith.constant 24 : index
    %c0_39 = arith.constant 0 : index
    %112 = vector.load %arg6[%c24, %c0_39] : memref<32x32xbf16, #tpu.memory_space<vmem>>, vector<8x32xbf16>
    %cst_40 = arith.constant dense<0.000000e+00> : vector<16x32xf32>
    %113 = tpu.matmul %111, %112, %cst_40 {dimension_numbers = #tpu.dot_dimension_numbers<[1], [0], [0], [1], [0, 0, 1, 1], [], []>} : vector<16x8xbf16>, vector<8x32xbf16>, vector<16x32xf32> -> vector<16x32xf32>
    %114 = arith.addf %94, %113 : vector<16x32xf32>
    %115 = arith.addf %2, %114 : vector<16x32xf32>
    %c0_41 = arith.constant 0 : index
    %c0_42 = arith.constant 0 : index
    %116 = vector.load %arg7[%c0_41, %c0_42] : memref<1x32xf32, #tpu.memory_space<vmem>>, vector<1x32xf32>
    %117 = vector.broadcast %116 : vector<1x32xf32> to vector<16x32xf32>
    %118 = arith.addf %115, %117 : vector<16x32xf32>
    %c0_43 = arith.constant 0 : index
    %c0_44 = arith.constant 0 : index
    %119 = vector.load %arg8[%c0_43, %c0_44] : memref<1x32xf32, #tpu.memory_space<vmem>>, vector<1x32xf32>
    %c0_45 = arith.constant 0 : index
    %c0_46 = arith.constant 0 : index
    %120 = vector.load %arg9[%c0_45, %c0_46] : memref<1x32xf32, #tpu.memory_space<vmem>>, vector<1x32xf32>
    %cst_47 = arith.constant dense<0.000000e+00> : vector<16xf32>
    %121 = vector.multi_reduction <add>, %118, %cst_47 [1] : vector<16x32xf32> to vector<16xf32>
    %122 = vector.shape_cast %121 : vector<16xf32> to vector<16x1xf32>
    %cst_48 = arith.constant 3.200000e+01 : f32
    %123 = vector.broadcast %cst_48 : f32 to vector<16x1xf32>
    %124 = arith.divf %122, %123 : vector<16x1xf32>
    %125 = vector.broadcast %124 : vector<16x1xf32> to vector<16x32xf32>
    %126 = arith.subf %118, %125 : vector<16x32xf32>
    %127 = arith.mulf %126, %126 : vector<16x32xf32>
    %cst_49 = arith.constant dense<0.000000e+00> : vector<16xf32>
    %128 = vector.multi_reduction <add>, %127, %cst_49 [1] : vector<16x32xf32> to vector<16xf32>
    %129 = vector.shape_cast %128 : vector<16xf32> to vector<16x1xf32>
    %cst_50 = arith.constant 3.200000e+01 : f32
    %130 = vector.broadcast %cst_50 : f32 to vector<16x1xf32>
    %131 = arith.divf %129, %130 : vector<16x1xf32>
    %132 = vector.broadcast %124 : vector<16x1xf32> to vector<16x32xf32>
    %133 = arith.subf %118, %132 : vector<16x32xf32>
    %cst_51 = arith.constant 9.99999974E-6 : f32
    %134 = vector.broadcast %cst_51 : f32 to vector<16x1xf32>
    %135 = arith.addf %131, %134 : vector<16x1xf32>
    %136 = math.rsqrt %135 : vector<16x1xf32>
    %137 = vector.broadcast %136 : vector<16x1xf32> to vector<16x32xf32>
    %138 = arith.mulf %133, %137 : vector<16x32xf32>
    %139 = vector.broadcast %119 : vector<1x32xf32> to vector<16x32xf32>
    %140 = arith.mulf %138, %139 : vector<16x32xf32>
    %141 = vector.broadcast %120 : vector<1x32xf32> to vector<16x32xf32>
    %142 = arith.addf %140, %141 : vector<16x32xf32>
    %143 = arith.truncf %142 : vector<16x32xf32> to vector<16x32xbf16>
    %c0_52 = arith.constant 0 : index
    %c0_53 = arith.constant 0 : index
    %144 = vector.load %arg10[%c0_52, %c0_53] : memref<32x128xbf16, #tpu.memory_space<vmem>>, vector<32x128xbf16>
    %cst_54 = arith.constant dense<0.000000e+00> : vector<16x128xf32>
    %145 = tpu.matmul %143, %144, %cst_54 {dimension_numbers = #tpu.dot_dimension_numbers<[1], [0], [0], [1], [0, 0, 1, 1], [], []>} : vector<16x32xbf16>, vector<32x128xbf16>, vector<16x128xf32> -> vector<16x128xf32>
    %c0_55 = arith.constant 0 : index
    %c0_56 = arith.constant 0 : index
    %146 = vector.load %arg11[%c0_55, %c0_56] : memref<1x128xf32, #tpu.memory_space<vmem>>, vector<1x128xf32>
    %147 = vector.broadcast %146 : vector<1x128xf32> to vector<16x128xf32>
    %148 = arith.addf %145, %147 : vector<16x128xf32>
    %cst_57 = arith.constant 5.000000e-01 : f32
    %149 = vector.broadcast %cst_57 : f32 to vector<16x128xf32>
    %150 = arith.mulf %149, %148 : vector<16x128xf32>
    %cst_58 = arith.constant 0.707106769 : f32
    %151 = vector.broadcast %cst_58 : f32 to vector<16x128xf32>
    %152 = arith.mulf %148, %151 : vector<16x128xf32>
    %153 = math.erf %152 : vector<16x128xf32>
    %cst_59 = arith.constant 1.000000e+00 : f32
    %154 = vector.broadcast %cst_59 : f32 to vector<16x128xf32>
    %155 = arith.addf %154, %153 : vector<16x128xf32>
    %156 = arith.mulf %150, %155 : vector<16x128xf32>
    %157 = arith.truncf %156 : vector<16x128xf32> to vector<16x128xbf16>
    %c0_60 = arith.constant 0 : index
    %c0_61 = arith.constant 0 : index
    %158 = vector.load %arg12[%c0_60, %c0_61] : memref<128x32xbf16, #tpu.memory_space<vmem>>, vector<128x32xbf16>
    %cst_62 = arith.constant dense<0.000000e+00> : vector<16x32xf32>
    %159 = tpu.matmul %157, %158, %cst_62 {dimension_numbers = #tpu.dot_dimension_numbers<[1], [0], [0], [1], [0, 0, 1, 1], [], []>} : vector<16x128xbf16>, vector<128x32xbf16>, vector<16x32xf32> -> vector<16x32xf32>
    %c0_63 = arith.constant 0 : index
    %c0_64 = arith.constant 0 : index
    %160 = vector.load %arg13[%c0_63, %c0_64] : memref<1x32xf32, #tpu.memory_space<vmem>>, vector<1x32xf32>
    %161 = vector.broadcast %160 : vector<1x32xf32> to vector<16x32xf32>
    %162 = arith.addf %159, %161 : vector<16x32xf32>
    %163 = arith.addf %118, %162 : vector<16x32xf32>
    %c0_65 = arith.constant 0 : index
    %c0_66 = arith.constant 0 : index
    %164 = vector.load %arg14[%c0_65, %c0_66] : memref<1x32xf32, #tpu.memory_space<vmem>>, vector<1x32xf32>
    %c0_67 = arith.constant 0 : index
    %c0_68 = arith.constant 0 : index
    %165 = vector.load %arg15[%c0_67, %c0_68] : memref<1x32xf32, #tpu.memory_space<vmem>>, vector<1x32xf32>
    %cst_69 = arith.constant dense<0.000000e+00> : vector<16xf32>
    %166 = vector.multi_reduction <add>, %163, %cst_69 [1] : vector<16x32xf32> to vector<16xf32>
    %167 = vector.shape_cast %166 : vector<16xf32> to vector<16x1xf32>
    %cst_70 = arith.constant 3.200000e+01 : f32
    %168 = vector.broadcast %cst_70 : f32 to vector<16x1xf32>
    %169 = arith.divf %167, %168 : vector<16x1xf32>
    %170 = vector.broadcast %169 : vector<16x1xf32> to vector<16x32xf32>
    %171 = arith.subf %163, %170 : vector<16x32xf32>
    %172 = arith.mulf %171, %171 : vector<16x32xf32>
    %cst_71 = arith.constant dense<0.000000e+00> : vector<16xf32>
    %173 = vector.multi_reduction <add>, %172, %cst_71 [1] : vector<16x32xf32> to vector<16xf32>
    %174 = vector.shape_cast %173 : vector<16xf32> to vector<16x1xf32>
    %cst_72 = arith.constant 3.200000e+01 : f32
    %175 = vector.broadcast %cst_72 : f32 to vector<16x1xf32>
    %176 = arith.divf %174, %175 : vector<16x1xf32>
    %177 = vector.broadcast %169 : vector<16x1xf32> to vector<16x32xf32>
    %178 = arith.subf %163, %177 : vector<16x32xf32>
    %cst_73 = arith.constant 9.99999974E-6 : f32
    %179 = vector.broadcast %cst_73 : f32 to vector<16x1xf32>
    %180 = arith.addf %176, %179 : vector<16x1xf32>
    %181 = math.rsqrt %180 : vector<16x1xf32>
    %182 = vector.broadcast %181 : vector<16x1xf32> to vector<16x32xf32>
    %183 = arith.mulf %178, %182 : vector<16x32xf32>
    %184 = vector.broadcast %164 : vector<1x32xf32> to vector<16x32xf32>
    %185 = arith.mulf %183, %184 : vector<16x32xf32>
    %186 = vector.broadcast %165 : vector<1x32xf32> to vector<16x32xf32>
    %187 = arith.addf %185, %186 : vector<16x32xf32>
    %c0_74 = arith.constant 0 : index
    %c0_75 = arith.constant 0 : index
    %c0_76 = arith.constant 0 : index
    %188 = vector.load %arg16[%c0_74, %c0_75, %c0_76] : memref<1x16x32xf32, #tpu.memory_space<vmem>>, vector<1x16x32xf32>
    %189 = vector.shape_cast %188 : vector<1x16x32xf32> to vector<16x32xf32>
    %190 = vector.shape_cast %187 : vector<16x32xf32> to vector<1x16x32xf32>
    tpu.vector_store %arg16[%c0_74, %c0_75, %c0_76], %190 {strides = array<i32>} : memref<1x16x32xf32, #tpu.memory_space<vmem>>, vector<1x16x32xf32>,
    return
  }
  func.func @transform_0(%arg0: i32) -> (i32, i32, i32) {
    %c0_i32 = arith.constant 0 : i32
    %c0_i32_0 = arith.constant 0 : i32
    %c0_i32_1 = arith.constant 0 : i32
    return %arg0, %c0_i32, %c0_i32_0 : i32, i32, i32
  }
  func.func @transform_1(%arg0: i32) -> (i32, i32) {
    %c0_i32 = arith.constant 0 : i32
    %c0_i32_0 = arith.constant 0 : i32
    %c0_i32_1 = arith.constant 0 : i32
    return %c0_i32, %c0_i32_0 : i32, i32
  }
  func.func @transform_2(%arg0: i32) -> (i32, i32) {
    %c0_i32 = arith.constant 0 : i32
    %c0_i32_0 = arith.constant 0 : i32
    %c0_i32_1 = arith.constant 0 : i32
    return %c0_i32, %c0_i32_0 : i32, i32
  }
  func.func @transform_3(%arg0: i32) -> (i32, i32) {
    %c0_i32 = arith.constant 0 : i32
    %c0_i32_0 = arith.constant 0 : i32
    %c0_i32_1 = arith.constant 0 : i32
    return %c0_i32, %c0_i32_0 : i32, i32
  }
  func.func @transform_4(%arg0: i32) -> (i32, i32) {
    %c0_i32 = arith.constant 0 : i32
    %c0_i32_0 = arith.constant 0 : i32
    %c0_i32_1 = arith.constant 0 : i32
    return %c0_i32, %c0_i32_0 : i32, i32
  }
  func.func @transform_5(%arg0: i32) -> (i32, i32) {
    %c0_i32 = arith.constant 0 : i32
    %c0_i32_0 = arith.constant 0 : i32
    %c0_i32_1 = arith.constant 0 : i32
    return %c0_i32, %c0_i32_0 : i32, i32
  }
  func.func @transform_6(%arg0: i32) -> (i32, i32) {
    %c0_i32 = arith.constant 0 : i32
    %c0_i32_0 = arith.constant 0 : i32
    %c0_i32_1 = arith.constant 0 : i32
    return %c0_i32, %c0_i32_0 : i32, i32
  }
  func.func @transform_7(%arg0: i32) -> (i32, i32) {
    %c0_i32 = arith.constant 0 : i32
    %c0_i32_0 = arith.constant 0 : i32
    %c0_i32_1 = arith.constant 0 : i32
    return %c0_i32, %c0_i32_0 : i32, i32
  }
  func.func @transform_8(%arg0: i32) -> (i32, i32) {
    %c0_i32 = arith.constant 0 : i32
    %c0_i32_0 = arith.constant 0 : i32
    %c0_i32_1 = arith.constant 0 : i32
    return %c0_i32, %c0_i32_0 : i32, i32
  }
  func.func @transform_9(%arg0: i32) -> (i32, i32) {
    %c0_i32 = arith.constant 0 : i32
    %c0_i32_0 = arith.constant 0 : i32
    %c0_i32_1 = arith.constant 0 : i32
    return %c0_i32, %c0_i32_0 : i32, i32
  }
  func.func @transform_10(%arg0: i32) -> (i32, i32) {
    %c0_i32 = arith.constant 0 : i32
    %c0_i32_0 = arith.constant 0 : i32
    %c0_i32_1 = arith.constant 0 : i32
    return %c0_i32, %c0_i32_0 : i32, i32
  }
  func.func @transform_11(%arg0: i32) -> (i32, i32) {
    %c0_i32 = arith.constant 0 : i32
    %c0_i32_0 = arith.constant 0 : i32
    %c0_i32_1 = arith.constant 0 : i32
    return %c0_i32, %c0_i32_0 : i32, i32
  }
  func.func @transform_12(%arg0: i32) -> (i32, i32) {
    %c0_i32 = arith.constant 0 : i32
    %c0_i32_0 = arith.constant 0 : i32
    %c0_i32_1 = arith.constant 0 : i32
    return %c0_i32, %c0_i32_0 : i32, i32
  }
  func.func @transform_13(%arg0: i32) -> (i32, i32) {
    %c0_i32 = arith.constant 0 : i32
    %c0_i32_0 = arith.constant 0 : i32
    %c0_i32_1 = arith.constant 0 : i32
    return %c0_i32, %c0_i32_0 : i32, i32
  }
  func.func @transform_14(%arg0: i32) -> (i32, i32) {
    %c0_i32 = arith.constant 0 : i32
    %c0_i32_0 = arith.constant 0 : i32
    %c0_i32_1 = arith.constant 0 : i32
    return %c0_i32, %c0_i32_0 : i32, i32
  }
  func.func @transform_15(%arg0: i32) -> (i32, i32, i32) {
    %c0_i32 = arith.constant 0 : i32
    %c0_i32_0 = arith.constant 0 : i32
    %c0_i32_1 = arith.constant 0 : i32
    return %arg0, %c0_i32, %c0_i32_0 : i32, i32, i32
  }
}

module attributes {stable_mosaic.version = 11 : i64} {
  func.func @block_kernel(%arg0: i32, %arg1: memref<1x16x32xbf16, #tpu.memory_space<vmem>>, %arg2: memref<1x32xf32, #tpu.memory_space<vmem>>, %arg3: memref<1x32xf32, #tpu.memory_space<vmem>>, %arg4: memref<32x96xbf16, #tpu.memory_space<vmem>>, %arg5: memref<1x96xf32, #tpu.memory_space<vmem>>, %arg6: memref<32x32xbf16, #tpu.memory_space<vmem>>, %arg7: memref<1x32xf32, #tpu.memory_space<vmem>>, %arg8: memref<1x32xf32, #tpu.memory_space<vmem>>, %arg9: memref<1x32xf32, #tpu.memory_space<vmem>>, %arg10: memref<32x128xbf16, #tpu.memory_space<vmem>>, %arg11: memref<1x128xf32, #tpu.memory_space<vmem>>, %arg12: memref<128x32xbf16, #tpu.memory_space<vmem>>, %arg13: memref<1x32xf32, #tpu.memory_space<vmem>>, %arg14: memref<1x32xf32, #tpu.memory_space<vmem>>, %arg15: memref<1x32xf32, #tpu.memory_space<vmem>>, %arg16: memref<1x16x32xbf16, #tpu.memory_space<vmem>>) attributes {dimension_semantics = [#tpu.dimension_semantics<parallel>], iteration_bounds = array<i64: 2>, scalar_prefetch = 0 : i64, scratch_operands = 0 : i64, tpu.core_type = #tpu.core_type<tc>, window_params = [{transform_indices = @transform_0, window_bounds = array<i64: 1, 16, 32>}, {pipeline_mode = #tpu.pipeline_mode<synchronous>, transform_indices = @transform_1, window_bounds = array<i64: 1, 32>}, {pipeline_mode = #tpu.pipeline_mode<synchronous>, transform_indices = @transform_2, window_bounds = array<i64: 1, 32>}, {pipeline_mode = #tpu.pipeline_mode<synchronous>, transform_indices = @transform_3, window_bounds = array<i64: 32, 96>}, {pipeline_mode = #tpu.pipeline_mode<synchronous>, transform_indices = @transform_4, window_bounds = array<i64: 1, 96>}, {pipeline_mode = #tpu.pipeline_mode<synchronous>, transform_indices = @transform_5, window_bounds = array<i64: 32, 32>}, {pipeline_mode = #tpu.pipeline_mode<synchronous>, transform_indices = @transform_6, window_bounds = array<i64: 1, 32>}, {pipeline_mode = #tpu.pipeline_mode<synchronous>, transform_indices = @transform_7, window_bounds = array<i64: 1, 32>}, {pipeline_mode = #tpu.pipeline_mode<synchronous>, transform_indices = @transform_8, window_bounds = array<i64: 1, 32>}, {pipeline_mode = #tpu.pipeline_mode<synchronous>, transform_indices = @transform_9, window_bounds = array<i64: 32, 128>}, {pipeline_mode = #tpu.pipeline_mode<synchronous>, transform_indices = @transform_10, window_bounds = array<i64: 1, 128>}, {pipeline_mode = #tpu.pipeline_mode<synchronous>, transform_indices = @transform_11, window_bounds = array<i64: 128, 32>}, {pipeline_mode = #tpu.pipeline_mode<synchronous>, transform_indices = @transform_12, window_bounds = array<i64: 1, 32>}, {pipeline_mode = #tpu.pipeline_mode<synchronous>, transform_indices = @transform_13, window_bounds = array<i64: 1, 32>}, {pipeline_mode = #tpu.pipeline_mode<synchronous>, transform_indices = @transform_14, window_bounds = array<i64: 1, 32>}, {transform_indices = @transform_15, window_bounds = array<i64: 1, 16, 32>}]} {
    %c0 = arith.constant 0 : index
    %c0_0 = arith.constant 0 : index
    %c0_1 = arith.constant 0 : index
    %0 = vector.load %arg1[%c0, %c0_0, %c0_1] : memref<1x16x32xbf16, #tpu.memory_space<vmem>>, vector<1x16x32xbf16>
    %1 = vector.shape_cast %0 : vector<1x16x32xbf16> to vector<16x32xbf16>
    %2 = arith.extf %1 : vector<16x32xbf16> to vector<16x32xf32>
    %c0_2 = arith.constant 0 : index
    %c0_3 = arith.constant 0 : index
    %3 = vector.load %arg2[%c0_2, %c0_3] : memref<1x32xf32, #tpu.memory_space<vmem>>, vector<1x32xf32>
    %c0_4 = arith.constant 0 : index
    %c0_5 = arith.constant 0 : index
    %4 = vector.load %arg3[%c0_4, %c0_5] : memref<1x32xf32, #tpu.memory_space<vmem>>, vector<1x32xf32>
    %cst = arith.constant dense<0.000000e+00> : vector<16xf32>
    %5 = vector.multi_reduction <add>, %2, %cst [1] : vector<16x32xf32> to vector<16xf32>
    %6 = vector.shape_cast %5 : vector<16xf32> to vector<16x1xf32>
    %cst_6 = arith.constant 3.200000e+01 : f32
    %7 = vector.broadcast %cst_6 : f32 to vector<16x1xf32>
    %8 = arith.divf %6, %7 : vector<16x1xf32>
    %9 = vector.broadcast %8 : vector<16x1xf32> to vector<16x32xf32>
    %10 = arith.subf %2, %9 : vector<16x32xf32>
    %11 = arith.mulf %10, %10 : vector<16x32xf32>
    %cst_7 = arith.constant dense<0.000000e+00> : vector<16xf32>
    %12 = vector.multi_reduction <add>, %11, %cst_7 [1] : vector<16x32xf32> to vector<16xf32>
    %13 = vector.shape_cast %12 : vector<16xf32> to vector<16x1xf32>
    %cst_8 = arith.constant 3.200000e+01 : f32
    %14 = vector.broadcast %cst_8 : f32 to vector<16x1xf32>
    %15 = arith.divf %13, %14 : vector<16x1xf32>
    %16 = vector.broadcast %8 : vector<16x1xf32> to vector<16x32xf32>
    %17 = arith.subf %2, %16 : vector<16x32xf32>
    %cst_9 = arith.constant 9.99999974E-6 : f32
    %18 = vector.broadcast %cst_9 : f32 to vector<16x1xf32>
    %19 = arith.addf %15, %18 : vector<16x1xf32>
    %20 = math.rsqrt %19 : vector<16x1xf32>
    %21 = vector.broadcast %20 : vector<16x1xf32> to vector<16x32xf32>
    %22 = arith.mulf %17, %21 : vector<16x32xf32>
    %23 = vector.broadcast %3 : vector<1x32xf32> to vector<16x32xf32>
    %24 = arith.mulf %22, %23 : vector<16x32xf32>
    %25 = vector.broadcast %4 : vector<1x32xf32> to vector<16x32xf32>
    %26 = arith.addf %24, %25 : vector<16x32xf32>
    %27 = arith.truncf %26 : vector<16x32xf32> to vector<16x32xbf16>
    %c0_10 = arith.constant 0 : index
    %c0_11 = arith.constant 0 : index
    %28 = vector.load %arg4[%c0_10, %c0_11] : memref<32x96xbf16, #tpu.memory_space<vmem>>, vector<32x96xbf16>
    %cst_12 = arith.constant dense<0.000000e+00> : vector<16x96xf32>
    %29 = tpu.matmul %27, %28, %cst_12 {dimension_numbers = #tpu.dot_dimension_numbers<[1], [0], [0], [1], [0, 0, 1, 1], [], []>} : vector<16x32xbf16>, vector<32x96xbf16>, vector<16x96xf32> -> vector<16x96xf32>
    %c0_13 = arith.constant 0 : index
    %c0_14 = arith.constant 0 : index
    %30 = vector.load %arg5[%c0_13, %c0_14] : memref<1x96xf32, #tpu.memory_space<vmem>>, vector<1x96xf32>
    %31 = vector.broadcast %30 : vector<1x96xf32> to vector<16x96xf32>
    %32 = arith.addf %29, %31 : vector<16x96xf32>
    %33 = arith.truncf %32 : vector<16x96xf32> to vector<16x96xbf16>
    %cst_15 = arith.constant 0.000000e+00 : f32
    %34 = vector.broadcast %cst_15 : f32 to vector<16x32xf32>
    %35 = vector.extract_strided_slice %33 {offsets = [0, 0], sizes = [16, 8], strides = [1, 1]} : vector<16x96xbf16> to vector<16x8xbf16>
    %36 = vector.extract_strided_slice %33 {offsets = [0, 32], sizes = [16, 8], strides = [1, 1]} : vector<16x96xbf16> to vector<16x8xbf16>
    %37 = vector.extract_strided_slice %33 {offsets = [0, 64], sizes = [16, 8], strides = [1, 1]} : vector<16x96xbf16> to vector<16x8xbf16>
    %cst_16 = arith.constant dense<0.000000e+00> : vector<16x16xf32>
    %38 = tpu.matmul %35, %36, %cst_16 {dimension_numbers = #tpu.dot_dimension_numbers<[1], [1], [0], [0], [0, 0, 1, 0], [], []>} : vector<16x8xbf16>, vector<16x8xbf16>, vector<16x16xf32> -> vector<16x16xf32>
    %cst_17 = arith.constant dense<0xFF800000> : vector<16xf32>
    %39 = vector.multi_reduction <maximumf>, %38, %cst_17 [1] : vector<16x16xf32> to vector<16xf32>
    %40 = vector.shape_cast %39 : vector<16xf32> to vector<16x1xf32>
    %41 = vector.broadcast %40 : vector<16x1xf32> to vector<16x16xf32>
    %42 = arith.subf %38, %41 : vector<16x16xf32>
    %43 = math.exp %42 : vector<16x16xf32>
    %cst_18 = arith.constant dense<0.000000e+00> : vector<16xf32>
    %44 = vector.multi_reduction <add>, %43, %cst_18 [1] : vector<16x16xf32> to vector<16xf32>
    %45 = vector.shape_cast %44 : vector<16xf32> to vector<16x1xf32>
    %46 = tpu.reciprocal %45 {approx = true} : vector<16x1xf32> -> vector<16x1xf32>
    %47 = vector.broadcast %46 : vector<16x1xf32> to vector<16x16xf32>
    %48 = arith.mulf %43, %47 : vector<16x16xf32>
    %49 = arith.truncf %48 : vector<16x16xf32> to vector<16x16xbf16>
    %cst_19 = arith.constant dense<0.000000e+00> : vector<16x8xf32>
    %50 = tpu.matmul %49, %37, %cst_19 {dimension_numbers = #tpu.dot_dimension_numbers<[1], [0], [0], [1], [0, 0, 1, 1], [], []>} : vector<16x16xbf16>, vector<16x8xbf16>, vector<16x8xf32> -> vector<16x8xf32>
    %51 = arith.truncf %50 : vector<16x8xf32> to vector<16x8xbf16>
    %c0_20 = arith.constant 0 : index
    %c0_21 = arith.constant 0 : index
    %52 = vector.load %arg6[%c0_20, %c0_21] : memref<32x32xbf16, #tpu.memory_space<vmem>>, vector<8x32xbf16>
    %cst_22 = arith.constant dense<0.000000e+00> : vector<16x32xf32>
    %53 = tpu.matmul %51, %52, %cst_22 {dimension_numbers = #tpu.dot_dimension_numbers<[1], [0], [0], [1], [0, 0, 1, 1], [], []>} : vector<16x8xbf16>, vector<8x32xbf16>, vector<16x32xf32> -> vector<16x32xf32>
    %54 = arith.addf %34, %53 : vector<16x32xf32>
    %55 = vector.extract_strided_slice %33 {offsets = [0, 8], sizes = [16, 8], strides = [1, 1]} : vector<16x96xbf16> to vector<16x8xbf16>
    %56 = vector.extract_strided_slice %33 {offsets = [0, 40], sizes = [16, 8], strides = [1, 1]} : vector<16x96xbf16> to vector<16x8xbf16>
    %57 = vector.extract_strided_slice %33 {offsets = [0, 72], sizes = [16, 8], strides = [1, 1]} : vector<16x96xbf16> to vector<16x8xbf16>
    %cst_23 = arith.constant dense<0.000000e+00> : vector<16x16xf32>
    %58 = tpu.matmul %55, %56, %cst_23 {dimension_numbers = #tpu.dot_dimension_numbers<[1], [1], [0], [0], [0, 0, 1, 0], [], []>} : vector<16x8xbf16>, vector<16x8xbf16>, vector<16x16xf32> -> vector<16x16xf32>
    %cst_24 = arith.constant dense<0xFF800000> : vector<16xf32>
    %59 = vector.multi_reduction <maximumf>, %58, %cst_24 [1] : vector<16x16xf32> to vector<16xf32>
    %60 = vector.shape_cast %59 : vector<16xf32> to vector<16x1xf32>
    %61 = vector.broadcast %60 : vector<16x1xf32> to vector<16x16xf32>
    %62 = arith.subf %58, %61 : vector<16x16xf32>
    %63 = math.exp %62 : vector<16x16xf32>
    %cst_25 = arith.constant dense<0.000000e+00> : vector<16xf32>
    %64 = vector.multi_reduction <add>, %63, %cst_25 [1] : vector<16x16xf32> to vector<16xf32>
    %65 = vector.shape_cast %64 : vector<16xf32> to vector<16x1xf32>
    %66 = tpu.reciprocal %65 {approx = true} : vector<16x1xf32> -> vector<16x1xf32>
    %67 = vector.broadcast %66 : vector<16x1xf32> to vector<16x16xf32>
    %68 = arith.mulf %63, %67 : vector<16x16xf32>
    %69 = arith.truncf %68 : vector<16x16xf32> to vector<16x16xbf16>
    %cst_26 = arith.constant dense<0.000000e+00> : vector<16x8xf32>
    %70 = tpu.matmul %69, %57, %cst_26 {dimension_numbers = #tpu.dot_dimension_numbers<[1], [0], [0], [1], [0, 0, 1, 1], [], []>} : vector<16x16xbf16>, vector<16x8xbf16>, vector<16x8xf32> -> vector<16x8xf32>
    %71 = arith.truncf %70 : vector<16x8xf32> to vector<16x8xbf16>
    %c8 = arith.constant 8 : index
    %c0_27 = arith.constant 0 : index
    %72 = vector.load %arg6[%c8, %c0_27] : memref<32x32xbf16, #tpu.memory_space<vmem>>, vector<8x32xbf16>
    %cst_28 = arith.constant dense<0.000000e+00> : vector<16x32xf32>
    %73 = tpu.matmul %71, %72, %cst_28 {dimension_numbers = #tpu.dot_dimension_numbers<[1], [0], [0], [1], [0, 0, 1, 1], [], []>} : vector<16x8xbf16>, vector<8x32xbf16>, vector<16x32xf32> -> vector<16x32xf32>
    %74 = arith.addf %54, %73 : vector<16x32xf32>
    %75 = vector.extract_strided_slice %33 {offsets = [0, 16], sizes = [16, 8], strides = [1, 1]} : vector<16x96xbf16> to vector<16x8xbf16>
    %76 = vector.extract_strided_slice %33 {offsets = [0, 48], sizes = [16, 8], strides = [1, 1]} : vector<16x96xbf16> to vector<16x8xbf16>
    %77 = vector.extract_strided_slice %33 {offsets = [0, 80], sizes = [16, 8], strides = [1, 1]} : vector<16x96xbf16> to vector<16x8xbf16>
    %cst_29 = arith.constant dense<0.000000e+00> : vector<16x16xf32>
    %78 = tpu.matmul %75, %76, %cst_29 {dimension_numbers = #tpu.dot_dimension_numbers<[1], [1], [0], [0], [0, 0, 1, 0], [], []>} : vector<16x8xbf16>, vector<16x8xbf16>, vector<16x16xf32> -> vector<16x16xf32>
    %cst_30 = arith.constant dense<0xFF800000> : vector<16xf32>
    %79 = vector.multi_reduction <maximumf>, %78, %cst_30 [1] : vector<16x16xf32> to vector<16xf32>
    %80 = vector.shape_cast %79 : vector<16xf32> to vector<16x1xf32>
    %81 = vector.broadcast %80 : vector<16x1xf32> to vector<16x16xf32>
    %82 = arith.subf %78, %81 : vector<16x16xf32>
    %83 = math.exp %82 : vector<16x16xf32>
    %cst_31 = arith.constant dense<0.000000e+00> : vector<16xf32>
    %84 = vector.multi_reduction <add>, %83, %cst_31 [1] : vector<16x16xf32> to vector<16xf32>
    %85 = vector.shape_cast %84 : vector<16xf32> to vector<16x1xf32>
    %86 = tpu.reciprocal %85 {approx = true} : vector<16x1xf32> -> vector<16x1xf32>
    %87 = vector.broadcast %86 : vector<16x1xf32> to vector<16x16xf32>
    %88 = arith.mulf %83, %87 : vector<16x16xf32>
    %89 = arith.truncf %88 : vector<16x16xf32> to vector<16x16xbf16>
    %cst_32 = arith.constant dense<0.000000e+00> : vector<16x8xf32>
    %90 = tpu.matmul %89, %77, %cst_32 {dimension_numbers = #tpu.dot_dimension_numbers<[1], [0], [0], [1], [0, 0, 1, 1], [], []>} : vector<16x16xbf16>, vector<16x8xbf16>, vector<16x8xf32> -> vector<16x8xf32>
    %91 = arith.truncf %90 : vector<16x8xf32> to vector<16x8xbf16>
    %c16 = arith.constant 16 : index
    %c0_33 = arith.constant 0 : index
    %92 = vector.load %arg6[%c16, %c0_33] : memref<32x32xbf16, #tpu.memory_space<vmem>>, vector<8x32xbf16>
    %cst_34 = arith.constant dense<0.000000e+00> : vector<16x32xf32>
    %93 = tpu.matmul %91, %92, %cst_34 {dimension_numbers = #tpu.dot_dimension_numbers<[1], [0], [0], [1], [0, 0, 1, 1], [], []>} : vector<16x8xbf16>, vector<8x32xbf16>, vector<16x32xf32> -> vector<16x32xf32>
    %94 = arith.addf %74, %93 : vector<16x32xf32>
    %95 = vector.extract_strided_slice %33 {offsets = [0, 24], sizes = [16, 8], strides = [1, 1]} : vector<16x96xbf16> to vector<16x8xbf16>
    %96 = vector.extract_strided_slice %33 {offsets = [0, 56], sizes = [16, 8], strides = [1, 1]} : vector<16x96xbf16> to vector<16x8xbf16>
    %97 = vector.extract_strided_slice %33 {offsets = [0, 88], sizes = [16, 8], strides = [1, 1]} : vector<16x96xbf16> to vector<16x8xbf16>
    %cst_35 = arith.constant dense<0.000000e+00> : vector<16x16xf32>
    %98 = tpu.matmul %95, %96, %cst_35 {dimension_numbers = #tpu.dot_dimension_numbers<[1], [1], [0], [0], [0, 0, 1, 0], [], []>} : vector<16x8xbf16>, vector<16x8xbf16>, vector<16x16xf32> -> vector<16x16xf32>
    %cst_36 = arith.constant dense<0xFF800000> : vector<16xf32>
    %99 = vector.multi_reduction <maximumf>, %98, %cst_36 [1] : vector<16x16xf32> to vector<16xf32>
    %100 = vector.shape_cast %99 : vector<16xf32> to vector<16x1xf32>
    %101 = vector.broadcast %100 : vector<16x1xf32> to vector<16x16xf32>
    %102 = arith.subf %98, %101 : vector<16x16xf32>
    %103 = math.exp %102 : vector<16x16xf32>
    %cst_37 = arith.constant dense<0.000000e+00> : vector<16xf32>
    %104 = vector.multi_reduction <add>, %103, %cst_37 [1] : vector<16x16xf32> to vector<16xf32>
    %105 = vector.shape_cast %104 : vector<16xf32> to vector<16x1xf32>
    %106 = tpu.reciprocal %105 {approx = true} : vector<16x1xf32> -> vector<16x1xf32>
    %107 = vector.broadcast %106 : vector<16x1xf32> to vector<16x16xf32>
    %108 = arith.mulf %103, %107 : vector<16x16xf32>
    %109 = arith.truncf %108 : vector<16x16xf32> to vector<16x16xbf16>
    %cst_38 = arith.constant dense<0.000000e+00> : vector<16x8xf32>
    %110 = tpu.matmul %109, %97, %cst_38 {dimension_numbers = #tpu.dot_dimension_numbers<[1], [0], [0], [1], [0, 0, 1, 1], [], []>} : vector<16x16xbf16>, vector<16x8xbf16>, vector<16x8xf32> -> vector<16x8xf32>
    %111 = arith.truncf %110 : vector<16x8xf32> to vector<16x8xbf16>
    %c24 = arith.constant 24 : index
    %c0_39 = arith.constant 0 : index
    %112 = vector.load %arg6[%c24, %c0_39] : memref<32x32xbf16, #tpu.memory_space<vmem>>, vector<8x32xbf16>
    %cst_40 = arith.constant dense<0.000000e+00> : vector<16x32xf32>
    %113 = tpu.matmul %111, %112, %cst_40 {dimension_numbers = #tpu.dot_dimension_numbers<[1], [0], [0], [1], [0, 0, 1, 1], [], []>} : vector<16x8xbf16>, vector<8x32xbf16>, vector<16x32xf32> -> vector<16x32xf32>
    %114 = arith.addf %94, %113 : vector<16x32xf32>
    %115 = arith.addf %2, %114 : vector<16x32xf32>
    %c0_41 = arith.constant 0 : index
    %c0_42 = arith.constant 0 : index
    %116 = vector.load %arg7[%c0_41, %c0_42] : memref<1x32xf32, #tpu.memory_space<vmem>>, vector<1x32xf32>
    %117 = vector.broadcast %116 : vector<1x32xf32> to vector<16x32xf32>
    %118 = arith.addf %115, %117 : vector<16x32xf32>
    %c0_43 = arith.constant 0 : index
    %c0_44 = arith.constant 0 : index
    %119 = vector.load %arg8[%c0_43, %c0_44] : memref<1x32xf32, #tpu.memory_space<vmem>>, vector<1x32xf32>
    %c0_45 = arith.constant 0 : index
    %c0_46 = arith.constant 0 : index
    %120 = vector.load %arg9[%c0_45, %c0_46] : memref<1x32xf32, #tpu.memory_space<vmem>>, vector<1x32xf32>
    %cst_47 = arith.constant dense<0.000000e+00> : vector<16xf32>
    %121 = vector.multi_reduction <add>, %118, %cst_47 [1] : vector<16x32xf32> to vector<16xf32>
    %122 = vector.shape_cast %121 : vector<16xf32> to vector<16x1xf32>
    %cst_48 = arith.constant 3.200000e+01 : f32
    %123 = vector.broadcast %cst_48 : f32 to vector<16x1xf32>
    %124 = arith.divf %122, %123 : vector<16x1xf32>
    %125 = vector.broadcast %124 : vector<16x1xf32> to vector<16x32xf32>
    %126 = arith.subf %118, %125 : vector<16x32xf32>
    %127 = arith.mulf %126, %126 : vector<16x32xf32>
    %cst_49 = arith.constant dense<0.000000e+00> : vector<16xf32>
    %128 = vector.multi_reduction <add>, %127, %cst_49 [1] : vector<16x32xf32> to vector<16xf32>
    %129 = vector.shape_cast %128 : vector<16xf32> to vector<16x1xf32>
    %cst_50 = arith.constant 3.200000e+01 : f32
    %130 = vector.broadcast %cst_50 : f32 to vector<16x1xf32>
    %131 = arith.divf %129, %130 : vector<16x1xf32>
    %132 = vector.broadcast %124 : vector<16x1xf32> to vector<16x32xf32>
    %133 = arith.subf %118, %132 : vector<16x32xf32>
    %cst_51 = arith.constant 9.99999974E-6 : f32
    %134 = vector.broadcast %cst_51 : f32 to vector<16x1xf32>
    %135 = arith.addf %131, %134 : vector<16x1xf32>
    %136 = math.rsqrt %135 : vector<16x1xf32>
    %137 = vector.broadcast %136 : vector<16x1xf32> to vector<16x32xf32>
    %138 = arith.mulf %133, %137 : vector<16x32xf32>
    %139 = vector.broadcast %119 : vector<1x32xf32> to vector<16x32xf32>
    %140 = arith.mulf %138, %139 : vector<16x32xf32>
    %141 = vector.broadcast %120 : vector<1x32xf32> to vector<16x32xf32>
    %142 = arith.addf %140, %141 : vector<16x32xf32>
    %143 = arith.truncf %142 : vector<16x32xf32> to vector<16x32xbf16>
    %c0_52 = arith.constant 0 : index
    %c0_53 = arith.constant 0 : index
    %144 = vector.load %arg10[%c0_52, %c0_53] : memref<32x128xbf16, #tpu.memory_space<vmem>>, vector<32x128xbf16>
    %cst_54 = arith.constant dense<0.000000e+00> : vector<16x128xf32>
    %145 = tpu.matmul %143, %144, %cst_54 {dimension_numbers = #tpu.dot_dimension_numbers<[1], [0], [0], [1], [0, 0, 1, 1], [], []>} : vector<16x32xbf16>, vector<32x128xbf16>, vector<16x128xf32> -> vector<16x128xf32>
    %c0_55 = arith.constant 0 : index
    %c0_56 = arith.constant 0 : index
    %146 = vector.load %arg11[%c0_55, %c0_56] : memref<1x128xf32, #tpu.memory_space<vmem>>, vector<1x128xf32>
    %147 = vector.broadcast %146 : vector<1x128xf32> to vector<16x128xf32>
    %148 = arith.addf %145, %147 : vector<16x128xf32>
    %cst_57 = arith.constant 5.000000e-01 : f32
    %149 = vector.broadcast %cst_57 : f32 to vector<16x128xf32>
    %150 = arith.mulf %149, %148 : vector<16x128xf32>
    %cst_58 = arith.constant 0.707106769 : f32
    %151 = vector.broadcast %cst_58 : f32 to vector<16x128xf32>
    %152 = arith.mulf %148, %151 : vector<16x128xf32>
    %153 = math.erf %152 : vector<16x128xf32>
    %cst_59 = arith.constant 1.000000e+00 : f32
    %154 = vector.broadcast %cst_59 : f32 to vector<16x128xf32>
    %155 = arith.addf %154, %153 : vector<16x128xf32>
    %156 = arith.mulf %150, %155 : vector<16x128xf32>
    %157 = arith.truncf %156 : vector<16x128xf32> to vector<16x128xbf16>
    %c0_60 = arith.constant 0 : index
    %c0_61 = arith.constant 0 : index
    %158 = vector.load %arg12[%c0_60, %c0_61] : memref<128x32xbf16, #tpu.memory_space<vmem>>, vector<128x32xbf16>
    %cst_62 = arith.constant dense<0.000000e+00> : vector<16x32xf32>
    %159 = tpu.matmul %157, %158, %cst_62 {dimension_numbers = #tpu.dot_dimension_numbers<[1], [0], [0], [1], [0, 0, 1, 1], [], []>} : vector<16x128xbf16>, vector<128x32xbf16>, vector<16x32xf32> -> vector<16x32xf32>
    %c0_63 = arith.constant 0 : index
    %c0_64 = arith.constant 0 : index
    %160 = vector.load %arg13[%c0_63, %c0_64] : memref<1x32xf32, #tpu.memory_space<vmem>>, vector<1x32xf32>
    %161 = vector.broadcast %160 : vector<1x32xf32> to vector<16x32xf32>
    %162 = arith.addf %159, %161 : vector<16x32xf32>
    %163 = arith.addf %118, %162 : vector<16x32xf32>
    %164 = arith.truncf %163 : vector<16x32xf32> to vector<16x32xbf16>
    %c0_65 = arith.constant 0 : index
    %c0_66 = arith.constant 0 : index
    %c0_67 = arith.constant 0 : index
    %165 = vector.load %arg16[%c0_65, %c0_66, %c0_67] : memref<1x16x32xbf16, #tpu.memory_space<vmem>>, vector<1x16x32xbf16>
    %166 = vector.shape_cast %165 : vector<1x16x32xbf16> to vector<16x32xbf16>
    %167 = vector.shape_cast %164 : vector<16x32xbf16> to vector<1x16x32xbf16>
    tpu.vector_store %arg16[%c0_65, %c0_66, %c0_67], %167 {strides = array<i32>} : memref<1x16x32xbf16, #tpu.memory_space<vmem>>, vector<1x16x32xbf16>,
    return
  }
  func.func @transform_0(%arg0: i32) -> (i32, i32, i32) {
    %c0_i32 = arith.constant 0 : i32
    %c0_i32_0 = arith.constant 0 : i32
    %c0_i32_1 = arith.constant 0 : i32
    return %arg0, %c0_i32, %c0_i32_0 : i32, i32, i32
  }
  func.func @transform_1(%arg0: i32) -> (i32, i32) {
    %c0_i32 = arith.constant 0 : i32
    %c0_i32_0 = arith.constant 0 : i32
    %c0_i32_1 = arith.constant 0 : i32
    return %c0_i32, %c0_i32_0 : i32, i32
  }
  func.func @transform_2(%arg0: i32) -> (i32, i32) {
    %c0_i32 = arith.constant 0 : i32
    %c0_i32_0 = arith.constant 0 : i32
    %c0_i32_1 = arith.constant 0 : i32
    return %c0_i32, %c0_i32_0 : i32, i32
  }
  func.func @transform_3(%arg0: i32) -> (i32, i32) {
    %c0_i32 = arith.constant 0 : i32
    %c0_i32_0 = arith.constant 0 : i32
    %c0_i32_1 = arith.constant 0 : i32
    return %c0_i32, %c0_i32_0 : i32, i32
  }
  func.func @transform_4(%arg0: i32) -> (i32, i32) {
    %c0_i32 = arith.constant 0 : i32
    %c0_i32_0 = arith.constant 0 : i32
    %c0_i32_1 = arith.constant 0 : i32
    return %c0_i32, %c0_i32_0 : i32, i32
  }
  func.func @transform_5(%arg0: i32) -> (i32, i32) {
    %c0_i32 = arith.constant 0 : i32
    %c0_i32_0 = arith.constant 0 : i32
    %c0_i32_1 = arith.constant 0 : i32
    return %c0_i32, %c0_i32_0 : i32, i32
  }
  func.func @transform_6(%arg0: i32) -> (i32, i32) {
    %c0_i32 = arith.constant 0 : i32
    %c0_i32_0 = arith.constant 0 : i32
    %c0_i32_1 = arith.constant 0 : i32
    return %c0_i32, %c0_i32_0 : i32, i32
  }
  func.func @transform_7(%arg0: i32) -> (i32, i32) {
    %c0_i32 = arith.constant 0 : i32
    %c0_i32_0 = arith.constant 0 : i32
    %c0_i32_1 = arith.constant 0 : i32
    return %c0_i32, %c0_i32_0 : i32, i32
  }
  func.func @transform_8(%arg0: i32) -> (i32, i32) {
    %c0_i32 = arith.constant 0 : i32
    %c0_i32_0 = arith.constant 0 : i32
    %c0_i32_1 = arith.constant 0 : i32
    return %c0_i32, %c0_i32_0 : i32, i32
  }
  func.func @transform_9(%arg0: i32) -> (i32, i32) {
    %c0_i32 = arith.constant 0 : i32
    %c0_i32_0 = arith.constant 0 : i32
    %c0_i32_1 = arith.constant 0 : i32
    return %c0_i32, %c0_i32_0 : i32, i32
  }
  func.func @transform_10(%arg0: i32) -> (i32, i32) {
    %c0_i32 = arith.constant 0 : i32
    %c0_i32_0 = arith.constant 0 : i32
    %c0_i32_1 = arith.constant 0 : i32
    return %c0_i32, %c0_i32_0 : i32, i32
  }
  func.func @transform_11(%arg0: i32) -> (i32, i32) {
    %c0_i32 = arith.constant 0 : i32
    %c0_i32_0 = arith.constant 0 : i32
    %c0_i32_1 = arith.constant 0 : i32
    return %c0_i32, %c0_i32_0 : i32, i32
  }
  func.func @transform_12(%arg0: i32) -> (i32, i32) {
    %c0_i32 = arith.constant 0 : i32
    %c0_i32_0 = arith.constant 0 : i32
    %c0_i32_1 = arith.constant 0 : i32
    return %c0_i32, %c0_i32_0 : i32, i32
  }
  func.func @transform_13(%arg0: i32) -> (i32, i32) {
    %c0_i32 = arith.constant 0 : i32
    %c0_i32_0 = arith.constant 0 : i32
    %c0_i32_1 = arith.constant 0 : i32
    return %c0_i32, %c0_i32_0 : i32, i32
  }
  func.func @transform_14(%arg0: i32) -> (i32, i32) {
    %c0_i32 = arith.constant 0 : i32
    %c0_i32_0 = arith.constant 0 : i32
    %c0_i32_1 = arith.constant 0 : i32
    return %c0_i32, %c0_i32_0 : i32, i32
  }
  func.func @transform_15(%arg0: i32) -> (i32, i32, i32) {
    %c0_i32 = arith.constant 0 : i32
    %c0_i32_0 = arith.constant 0 : i32
    %c0_i32_1 = arith.constant 0 : i32
    return %arg0, %c0_i32, %c0_i32_0 : i32, i32, i32
  }
}

</mosaic_0001>

<bundles_post_ra>
// kernel: vision_transformer2_forward.2
= control target key start
LH: loop header
LB: loop body
LE: loop exit
PB: predicated region body
PF: predicated region fallthrough
CT: control target
= control target key end

     0   :  { %s1995_s18 = smov 0   ;;  %s2231_s0 = inlined_call_operand.vmem [shape: bf16[2,16,32], index: 0, kind: input, shape index: {}]   ;;  %s2232_s1 = inlined_call_operand.vmem [shape: f32[1,32], index: 1, kind: input, shape index: {}]   ;;  %s2233_s2 = inlined_call_operand.vmem [shape: f32[1,32], index: 2, kind: input, shape index: {}]   ;;  %s2234_s3 = inlined_call_operand.vmem [shape: bf16[32,96], index: 3, kind: input, shape index: {}]   ;;  %s2235_s4 = inlined_call_operand.vmem [shape: f32[1,96], index: 4, kind: input, shape index: {}]   ;;  %s2236_s5 = inlined_call_operand.vmem [shape: bf16[32,32], index: 5, kind: input, shape index: {}]   ;;  %s2237_s6 = inlined_call_operand.vmem [shape: f32[1,32], index: 6, kind: input, shape index: {}]   ;;  %s2238_s7 = inlined_call_operand.vmem [shape: f32[1,32], index: 7, kind: input, shape index: {}]   ;;  %s2239_s8 = inlined_call_operand.vmem [shape: f32[1,32], index: 8, kind: input, shape index: {}]   ;;  %s2240_s9 = inlined_call_operand.vmem [shape: bf16[32,128], index: 9, kind: input, shape index: {}]   ;;  %s2241_s10 = inlined_call_operand.vmem [shape: f32[1,128], index: 10, kind: input, shape index: {}]   ;;  %s2242_s11 = inlined_call_operand.vmem [shape: bf16[128,32], index: 11, kind: input, shape index: {}]   ;;  %s2243_s12 = inlined_call_operand.vmem [shape: f32[1,32], index: 12, kind: input, shape index: {}]   ;;  %s2244_s13 = inlined_call_operand.vmem [shape: f32[1,32], index: 13, kind: input, shape index: {}]   ;;  %s2245_s14 = inlined_call_operand.vmem [shape: f32[1,32], index: 14, kind: input, shape index: {}]   ;;  %s2246_s15 = inlined_call_operand.vmem [shape: bf16[2,16,32], index: 15, kind: output, shape index: {}]  }
   0x1 LB: > { %s1615_s19 = sadd.s32 4294967295, %s1900_s18   ;;  %p1619_p0 = scmp.ge.s32.totalorder %s1900_s18, 1  ;;  %s1900_s18 = sphi %s1995_s18, %s25_s18  }
   0x2   : > { %p437_p1 = scmp.lt.s32.totalorder %s1900_s18, 3 }
   0x4   : > { %p438_p2 = pnand %p1619_p0, %p437_p1 }
   0x5   : > { %p485_p3 = scmp.lt.s32.totalorder (!%p438_p2), %s1615_s19, 1  ;;  %vm502_vm0 = vcmask (!%p438_p2), 261120   ;;  %v1838_v15 = vld [vmem:[%s2234_s3] sm:$0xff] (!%p438_p2)   ;;  %v1902_v16 = vmov (!%p438_p2), 0.0   ;;  %v1839_v17 = vld [vmem:[%s2234_s3 + $0x8] sm:$0xff] (!%p438_p2)   ;;  %vm1903_vm1 = vmmov (!%p438_p2), 0  }
   0x6   : > { %441 = sbr.rel (%p438_p2) target bundleno = 4254 (0x109e), region = 80  ;;  %1709 = vmatprep.subr.bf16.mxu1 (!%p438_p2), %v1902_v16  ;;  %1735 = vmatprep.subr.bf16.mxu0 (!%p438_p2), %v1902_v16  ;;  %v1624_v26 = vld [vmem:[%s2232_s1] ss:$0 sm:$0xff] (!%p438_p2)  ;;  %s1904_s17 = smov (!%p438_p2), 96   ;;  %vm618_vm2 = vcmask (!%p438_p2), 64512   ;;  %vm666_vm3 = vcmask (!%p438_p2), 130048  }
   0x7   : > { %1710 = vmatpush3.bf16.msra.mxu1 (!%p438_p2), %v1838_v15  ;;  %1713 = vmatprep.mubr.msk.bf16.mxu1 (!%p438_p2), %vm1903_vm1, %v1902_v16  ;;  %v1625_v30 = vld [vmem:[%s2233_s2] ss:$0 sm:$0xff] (!%p438_p2)  ;;  %s1905_s14 = smov (!%p438_p2), 88   ;;  %s1906_s20 = smov (!%p438_p2), 120   ;;  %vm865_vm4 = vcmask (!%p438_p2), 1043456   ;;  %vm1557_vm5 = vcmask (!%p438_p2), 257024  }
   0x8   : > { %1711 = vmatprep.subr.bf16.mxu1 (!%p438_p2), %v1902_v16  ;;  %1737 = vmatprep.mubr.msk.bf16.mxu0 (!%p438_p2), %vm1903_vm1, %v1902_v16  ;;  %v1626_v35 = vld [vmem:[%s2235_s4] ss:$0 sm:$0xff] (!%p438_p2)  ;;  %s1908_s22 = smov (!%p438_p2), 80   ;;  %s1909_s23 = smov (!%p438_p2), 112  }
   0x9   : > { %s1910_s24 = smov (!%p438_p2), 56   ;;  %s1911_s29 = smov (!%p438_p2), 48  }
   0xa   : > { %s1912_s30 = smov (!%p438_p2), 104   ;;  %s1913_s16 = smov (!%p438_p2), 72  }
   0xb   : > { %1712 = vmatpush3.bf16.msra.mxu1 (!%p438_p2), %v1839_v17 }
   0xc   : > { %1717 = vmatprep.subr.bf16.mxu1 (!%p438_p2), %v1902_v16 }
   0xd   : > { %s2248_s19 = smov (!%p485_p3, %s1615_s19), 1 }
   0xe   : > { %s1662_s13 = sshll.u32 %s2248_s19, 3 }
   0xf   : > { %s489_s21 = scalar_lea.vmem %s2231_s0, %s1662_s13  ;;  %s494_s27 = scalar_lea.vmem %s2246_s15, %s1662_s13 }
  0x10   : > { %v1667_v0 = vld [vmem:[%s489_s21] sm:$0xff]   ;;  %s1907_s21 = smov 64  }
  0x11   : > { %v2011_v1 = vunpack.c.l.bf16 %v1667_v0  ;;  %v2013_v2 = vunpack.c.h.bf16 %v1667_v0 }
  0x13   : > { %v503_v3 = vsel %vm502_vm0, %v2011_v1, 0.0  ;;  %v506_v4 = vsel %vm502_vm0, %v2013_v2, 0.0 }
  0x14   : > { %504 = vadd.xlane.f32.xlu0 %v503_v3 }
  0x18   : > { %507 = vadd.xlane.f32.xlu0 %v506_v4 }
  0xa1   : > { %v505_v5 = vpop.xlane.xlu0 %504 }
  0xa2   : > { %v510_v6 = vmul.f32 0.03125, %v505_v5 }
  0xa4   : > { %v512_v7 = vsub.f32 %v2011_v1, %v510_v6 }
  0xa5   : > { %v508_v8 = vpop.xlane.xlu0 %507 }
  0xa6   : > { %v511_v9 = vmul.f32 0.03125, %v508_v8  ;;  %v514_v10 = vmul.f32 %v512_v7, %v512_v7 }
  0xa8   : > { %v513_v11 = vsub.f32 %v2013_v2, %v511_v9  ;;  %v516_v12 = vsel %vm502_vm0, %v514_v10, 0.0 }
  0xa9   : > { %517 = vadd.xlane.f32.xlu1 %v516_v12 }
  0xaa   : > { %v515_v13 = vmul.f32 %v513_v11, %v513_v11 }
  0xac   : > { %v519_v14 = vsel %vm502_vm0, %v515_v13, 0.0 }
  0xad   : > { %520 = vadd.xlane.f32.xlu1 %v519_v14 }
 0x136   : > { %v518_v18 = vpop.xlane.xlu1 %517 }
 0x137   : > { %v522_v19 = vmul.f32 0.03125, %v518_v18 }
 0x139   : > { %v524_v20 = vadd.f32 1e-05, %v522_v19 }
 0x13a   : > { %v521_v21 = vpop.xlane.xlu1 %520 }
 0x13b   : > { %1850 = vrsqrt.f32 %v524_v20  ;;  %v523_v22 = vmul.f32 0.03125, %v521_v21 }
 0x13d   : > { %v525_v23 = vadd.f32 1e-05, %v523_v22 }
 0x13f   : > { %1852 = vrsqrt.f32 %v525_v23 }
 0x145   : > { %v1851_v24 = vpop.eup %1850 }
 0x146   : > { %v528_v25 = vmul.f32 %v1851_v24, %v512_v7 }
 0x148   : > { %v536_v29 = vmul.f32 %v1624_v26, %v528_v25 }
 0x149   : > { %v1853_v27 = vpop.eup %1852 }
 0x14a   : > { %v529_v28 = vmul.f32 %v1853_v27, %v513_v11  ;;  %v544_v32 = vadd.f32 %v1625_v30, %v536_v29 }
 0x14c   : > { %v537_v31 = vmul.f32 %v1624_v26, %v529_v28 }
 0x14e   : > { %v545_v33 = vadd.f32 %v1625_v30, %v537_v31 }
 0x150   : > { %v546_v34 = vpack.c.bf16 %v545_v33, %v544_v32  ;;  %v861_v32 = vld [vmem:[%s2236_s5 + $0x4] sm:$0xf] }
 0x151   : > { %v867_v33 = vsel %vm865_vm4, %v861_v32, 0 }
 0x152   : > { %1714 = vmatmul.mubr.msk.bf16.vlgmr.msra.gmra.mrb[0].mxu1 %vm502_vm0, %v546_v34 }
 0x153   : > { %1719 = vmatprep.mubr.msk.bf16.mxu1 %vm1903_vm1, %v1902_v16 }
 0x225   : > { %v607_v36 = vpop.f32.mrb[0].mxu1 }
 0x226   : > { %v1715_v37 = vpop.f32.mrb[1].mxu1  ;;  %v608_v39 = vadd.f32 %v1626_v35, %v607_v36 }
 0x227   : > { %v610_v38 = vpop.f32.mrb[2].mxu1 }
 0x228   : > { %v611_v40 = vadd.f32 %v1626_v35, %v610_v38  ;;  %v1716_v41 = vpop.f32.mrb[3].mxu1 }
 0x22a   : > { %v2049_v42 = vpack.c.bf16 %v611_v40, %v608_v39  ;;  %v738_v39 = vld [vmem:[%s2236_s5] sm:$0xf] }
 0x22c   : > { %616 = vrot.lane.b32.xlu0 %v2049_v42, %s1904_s17 }
 0x230   : > { %741 = vrot.lane.b32.xlu0 %v2049_v42, %s1905_s14 }
 0x234   : > { %739 = vrot.lane.b32.xlu0 %v2049_v42, %s1906_s20  ;;  %s1914_s20 = smov 40  }
 0x29e   : > { %v617_v43 = vpop.permute.xlu0 %616 }
 0x29f   : > { %v623_v44 = vsel %vm618_vm2, %v617_v43, 0 }
 0x2a0   : > { %1718 = vmatpush3.bf16.xpose.msra.mxu1 %v623_v44  ;;  %v914_v44 = vsel %vm865_vm4, %v738_v39, 0 }
 0x2a1   : > { %1723 = vmatprep.subr.bf16.mxu1 %v1902_v16 }
 0x2a2   : > { %v742_v6 = vpop.permute.xlu0 %741 }
 0x2a3   : > { %v747_v8 = vsel %vm618_vm2, %v742_v6, 0 }
 0x2a6   : > { %v740_v9 = vpop.permute.xlu0 %739 }
 0x2a7   : > { %1720 = vmatmul.mubr.msk.bf16.vlgmr.msra.gmra.mrb[4].mxu1 %vm618_vm2, %v2049_v42 }
 0x2a8   : > { %1725 = vmatprep.mubr.msk.bf16.mxu1 %vm1903_vm1, %v1902_v16 }
 0x37a   : > { %v659_v45 = vpop.f32.mrb[4].mxu1 }
 0x37b   : > { %v1721_v46 = vpop.f32.mrb[5].mxu1  ;;  %v667_v47 = vsel %vm666_vm3, %v659_v45, -inf }
 0x37c   : > { %668 = vmax.xlane.f32.xlu1 %v667_v47  ;;  %v662_v48 = vpop.f32.mrb[6].mxu1 }
 0x37d   : > { %v1722_v49 = vpop.f32.mrb[7].mxu1  ;;  %v670_v50 = vsel %vm666_vm3, %v662_v48, -inf }
 0x380   : > { %671 = vmax.xlane.f32.xlu1 %v670_v50 }
 0x409   : > { %v669_v51 = vpop.xlane.xlu1 %668 }
 0x40a   : > { %v673_v52 = vsub.f32 %v659_v45, %v669_v51 }
 0x40c   : > { %v675_v53 = vmul.f32 1.442695, %v673_v52 }
 0x40d   : > { %v672_v54 = vpop.xlane.xlu1 %671 }
 0x40e   : > { %1854 = vpow2.f32 %v675_v53  ;;  %v674_v55 = vsub.f32 %v662_v48, %v672_v54 }
 0x410   : > { %v677_v56 = vmul.f32 1.442695, %v674_v55 }
 0x412   : > { %1856 = vpow2.f32 %v677_v56 }
 0x418   : > { %v1855_v57 = vpop.eup %1854 }
 0x419   : > { %v679_v58 = vsel %vm666_vm3, %v1855_v57, 0.0 }
 0x41a   : > { %680 = vadd.xlane.f32.xlu1 %v679_v58 }
 0x41c   : > { %v1857_v59 = vpop.eup %1856 }
 0x41d   : > { %v682_v60 = vsel %vm666_vm3, %v1857_v59, 0.0 }
 0x41e   : > { %683 = vadd.xlane.f32.xlu1 %v682_v60 }
 0x42f   : > { %690 = vrot.lane.b32.xlu1 %v2049_v42, %s1907_s21 }
 0x4a7   : > { %v681_v61 = vpop.xlane.xlu1 %680 }
 0x4a8   : > { %1858 = vrcp.f32 %v681_v61 }
 0x4ab   : > { %v684_v62 = vpop.xlane.xlu1 %683 }
 0x4ac   : > { %1860 = vrcp.f32 %v684_v62 }
 0x4af   : > { %v691_v63 = vpop.permute.xlu1 %690 }
 0x4b0   : > { %1724 = vmatpush3.bf16.msra.mxu1 %v691_v63 }
 0x4b1   : > { %1729 = vmatprep.subr.bf16.mxu1 %v1902_v16 }
 0x4b2   : > { %v1859_v0 = vpop.eup %1858 }
 0x4b3   : > { %v687_v4 = vmul.f32 %v1859_v0, %v1855_v57 }
 0x4b6   : > { %v1861_v3 = vpop.eup %1860 }
 0x4b7   : > { %v688_v5 = vmul.f32 %v1861_v3, %v1857_v59 }
 0x4b9   : > { %v689_v7 = vpack.c.bf16 %v688_v5, %v687_v4 }
 0x4bb   : > { %1726 = vmatmul.mubr.msk.bf16.vlgmr.msra.gmra.mrb[8].mxu1 %vm666_vm3, %v689_v7 }
 0x4bc   : > { %1730 = vmatpush3.bf16.xpose.msra.mxu1 %v747_v8  ;;  %1731 = vmatprep.mubr.msk.bf16.mxu1 %vm1903_vm1, %v1902_v16 }
 0x4bd   : > { %1741 = vmatprep.subr.bf16.mxu1 %v1902_v16 }
 0x4c3   : > { %1732 = vmatmul.mubr.msk.bf16.vlgmr.msra.gmra.mrb[12].mxu1 %vm618_vm2, %v740_v9 }
 0x4c4   : > { %1743 = vmatprep.mubr.msk.bf16.mxu1 %vm1903_vm1, %v1902_v16  ;;  %1742 = vmatpush3.bf16.msra.mxu1 %v867_v33 }
 0x4c5   : > { %1753 = vmatprep.subr.bf16.mxu1 %v1902_v16 }
 0x58e   : > { %v730_v10 = vpop.f32.mrb[8].mxu1 }
 0x58f   : > { %v1727_v11 = vpop.f32.mrb[9].mxu1 }
 0x590   : > { %v733_v12 = vpop.f32.mrb[10].mxu1 }
 0x591   : > { %v737_v13 = vpack.c.bf16 %v733_v12, %v730_v10  ;;  %v1728_v14 = vpop.f32.mrb[11].mxu1 }
 0x596   : > { %v783_v15 = vpop.f32.mrb[12].mxu1 }
 0x597   : > { %v1733_v17 = vpop.f32.mrb[13].mxu1  ;;  %v790_v18 = vsel %vm666_vm3, %v783_v15, -inf }
 0x598   : > { %791 = vmax.xlane.f32.xlu0 %v790_v18  ;;  %v786_v19 = vpop.f32.mrb[14].mxu1 }
 0x599   : > { %v1734_v20 = vpop.f32.mrb[15].mxu1  ;;  %v793_v21 = vsel %vm666_vm3, %v786_v19, -inf }
 0x59a   : > { %794 = vmax.xlane.f32.xlu1 %v793_v21 }
 0x5ab   : > { %959 = vrot.lane.b32.xlu1 %v2049_v42, %s1908_s22 }
 0x5af   : > { %957 = vrot.lane.b32.xlu1 %v2049_v42, %s1909_s23 }
 0x625   : > { %v792_v22 = vpop.xlane.xlu0 %791 }
 0x626   : > { %v796_v23 = vsub.f32 %v783_v15, %v792_v22 }
 0x627   : > { %v795_v24 = vpop.xlane.xlu1 %794 }
 0x628   : > { %v798_v25 = vmul.f32 1.442695, %v796_v23  ;;  %v797_v26 = vsub.f32 %v786_v19, %v795_v24 }
 0x62a   : > { %1862 = vpow2.f32 %v798_v25  ;;  %v800_v27 = vmul.f32 1.442695, %v797_v26 }
 0x62b   : > { %v960_v47 = vpop.permute.xlu1 %959 }
 0x62c   : > { %1864 = vpow2.f32 %v800_v27  ;;  %v965_v51 = vsel %vm618_vm2, %v960_v47, 0 }
 0x62f   : > { %v958_v56 = vpop.permute.xlu1 %957 }
 0x634   : > { %v1863_v28 = vpop.eup %1862 }
 0x635   : > { %v802_v29 = vsel %vm666_vm3, %v1863_v28, 0.0 }
 0x636   : > { %v1865_v30 = vpop.eup %1864  ;;  %803 = vadd.xlane.f32.xlu0 %v802_v29  ;;  %v1079_v29 = vld [vmem:[%s2236_s5 + $0x8] sm:$0xf] }
 0x637   : > { %v805_v31 = vsel %vm666_vm3, %v1865_v30, 0.0 }
 0x63a   : > { %806 = vadd.xlane.f32.xlu0 %v805_v31 }
 0x650   : > { %813 = vrot.lane.b32.xlu0 %v2049_v42, %s1910_s24 }
 0x6c3   : > { %v804_v34 = vpop.xlane.xlu0 %803 }
 0x6c4   : > { %1866 = vrcp.f32 %v804_v34 }
 0x6c7   : > { %v807_v35 = vpop.xlane.xlu0 %806 }
 0x6c8   : > { %1868 = vrcp.f32 %v807_v35 }
 0x6cb   : > { %v814_v36 = vpop.permute.xlu0 %813 }
 0x6cc   : > { %1736 = vmatpush3.bf16.msra.mxu0 %v814_v36 }
 0x6cd   : > { %1747 = vmatprep.subr.bf16.mxu0 %v1902_v16 }
 0x6ce   : > { %v1867_v37 = vpop.eup %1866 }
 0x6cf   : > { %v810_v40 = vmul.f32 %v1867_v37, %v1863_v28 }
 0x6d2   : > { %v1869_v38 = vpop.eup %1868 }
 0x6d3   : > { %v811_v41 = vmul.f32 %v1869_v38, %v1865_v30  ;;  %v1084_v30 = vsel %vm865_vm4, %v1079_v29, 0 }
 0x6d5   : > { %v812_v43 = vpack.c.bf16 %v811_v41, %v810_v40 }
 0x6d7   : > { %1738 = vmatmul.mubr.msk.bf16.vlgmr.msra.gmra.mrb[0].mxu0 %vm666_vm3, %v812_v43 }
 0x6d8   : > { %1748 = vmatpush3.bf16.msra.mxu0 %v914_v44  ;;  %1749 = vmatprep.mubr.msk.bf16.mxu0 %vm1903_vm1, %v1902_v16 }
 0x6d9   : > { %1759 = vmatprep.subr.bf16.mxu0 %v1902_v16 }
 0x6df   : > { %1750 = vmatmul.mubr.msk.bf16.vlgmr.msra.gmra.mrb[4].mxu0 %vm618_vm2, %v737_v13 }
 0x6e0   : > { %1761 = vmatprep.mubr.msk.bf16.mxu0 %vm1903_vm1, %v1902_v16 }
 0x7aa   : > { %v853_v45 = vpop.f32.mrb[0].mxu0 }
 0x7ab   : > { %v1739_v46 = vpop.f32.mrb[1].mxu0 }
 0x7ac   : > { %v856_v48 = vpop.f32.mrb[2].mxu0 }
 0x7ad   : > { %v860_v49 = vpack.c.bf16 %v856_v48, %v853_v45  ;;  %v1740_v50 = vpop.f32.mrb[3].mxu0 }
 0x7af   : > { %1744 = vmatmul.mubr.msk.bf16.vlgmr.msra.gmra.mrb[16].mxu1 %vm618_vm2, %v860_v49 }
 0x7b0   : > { %1754 = vmatpush3.bf16.xpose.msra.mxu1 %v965_v51  ;;  %1755 = vmatprep.mubr.msk.bf16.mxu1 %vm1903_vm1, %v1902_v16 }
 0x7b1   : > { %1765 = vmatprep.subr.bf16.mxu1 %v1902_v16 }
 0x7b2   : > { %v950_v52 = vpop.f32.mrb[4].mxu0 }
 0x7b3   : > { %v1751_v53 = vpop.f32.mrb[5].mxu0 }
 0x7b4   : > { %v953_v54 = vpop.f32.mrb[6].mxu0  ;;  %v1251_v53 = vld [vmem:[%s2236_s5 + $0xc] sm:$0xf] }
 0x7b5   : > { %v1752_v55 = vpop.f32.mrb[7].mxu0 }
 0x7b7   : > { %1756 = vmatmul.mubr.msk.bf16.vlgmr.msra.gmra.mrb[20].mxu1 %vm618_vm2, %v958_v56 }
 0x7b8   : > { %1767 = vmatprep.mubr.msk.bf16.mxu1 %vm1903_vm1, %v1902_v16  ;;  %1766 = vmatpush3.bf16.msra.mxu1 %v1084_v30 }
 0x7b9   : > { %1777 = vmatprep.subr.bf16.mxu1 %v1902_v16 }
 0x882   : > { %v903_v57 = vpop.f32.mrb[16].mxu1 }
 0x883   : > { %v2106_v58 = vadd.f32 %v950_v52, %v903_v57  ;;  %v1745_v59 = vpop.f32.mrb[17].mxu1 }
 0x884   : > { %v906_v60 = vpop.f32.mrb[18].mxu1 }
 0x885   : > { %v2108_v61 = vadd.f32 %v953_v54, %v906_v60  ;;  %v1746_v62 = vpop.f32.mrb[19].mxu1  ;;  %v1256_v54 = vsel %vm865_vm4, %v1251_v53, 0 }
 0x88a   : > { %v1001_v63 = vpop.f32.mrb[20].mxu1 }
 0x88b   : > { %v1757_v0 = vpop.f32.mrb[21].mxu1  ;;  %v1008_v3 = vsel %vm666_vm3, %v1001_v63, -inf }
 0x88c   : > { %1009 = vmax.xlane.f32.xlu1 %v1008_v3  ;;  %v1004_v4 = vpop.f32.mrb[22].mxu1 }
 0x88d   : > { %v1758_v5 = vpop.f32.mrb[23].mxu1  ;;  %v1011_v6 = vsel %vm666_vm3, %v1004_v4, -inf }
 0x88e   : > { %1012 = vmax.xlane.f32.xlu0 %v1011_v6 }
 0x89d   : > { %1031 = vrot.lane.b32.xlu1 %v2049_v42, %s1911_s29 }
 0x8a1   : > { %1129 = vrot.lane.b32.xlu1 %v2049_v42, %s1912_s30 }
 0x919   : > { %v1010_v7 = vpop.xlane.xlu1 %1009 }
 0x91a   : > { %v1014_v8 = vsub.f32 %v1001_v63, %v1010_v7 }
 0x91b   : > { %v1013_v9 = vpop.xlane.xlu0 %1012 }
 0x91c   : > { %v1016_v10 = vmul.f32 1.442695, %v1014_v8  ;;  %v1015_v11 = vsub.f32 %v1004_v4, %v1013_v9 }
 0x91d   : > { %v1032_v12 = vpop.permute.xlu1 %1031 }
 0x91e   : > { %1870 = vpow2.f32 %v1016_v10  ;;  %v1018_v13 = vmul.f32 1.442695, %v1015_v11  ;;  %1760 = vmatpush3.bf16.msra.mxu0 %v1032_v12 }
 0x91f   : > { %1771 = vmatprep.subr.bf16.mxu0 %v1902_v16 }
 0x920   : > { %1872 = vpow2.f32 %v1018_v13 }
 0x921   : > { %v1130_v28 = vpop.permute.xlu1 %1129 }
 0x928   : > { %v1871_v14 = vpop.eup %1870 }
 0x929   : > { %v1020_v15 = vsel %vm666_vm3, %v1871_v14, 0.0 }
 0x92a   : > { %v1873_v17 = vpop.eup %1872  ;;  %1021 = vadd.xlane.f32.xlu0 %v1020_v15 }
 0x92b   : > { %v1023_v18 = vsel %vm666_vm3, %v1873_v17, 0.0 }
 0x92e   : > { %1024 = vadd.xlane.f32.xlu0 %v1023_v18 }
 0x944   : > { %1131 = vrot.lane.b32.xlu0 %v2049_v42, %s1913_s16 }
 0x9b7   : > { %v1022_v19 = vpop.xlane.xlu0 %1021 }
 0x9b8   : > { %1874 = vrcp.f32 %v1022_v19 }
 0x9bb   : > { %v1025_v20 = vpop.xlane.xlu0 %1024 }
 0x9bc   : > { %1876 = vrcp.f32 %v1025_v20 }
 0x9bf   : > { %v1132_v25 = vpop.permute.xlu0 %1131 }
 0x9c0   : > { %v1137_v27 = vsel %vm618_vm2, %v1132_v25, 0 }
 0x9c2   : > { %v1875_v21 = vpop.eup %1874 }
 0x9c3   : > { %v1028_v23 = vmul.f32 %v1875_v21, %v1871_v14  ;;  %v1642_v14 = vld [vmem:[%s2237_s6] ss:$0 sm:$0xff] }
 0x9c6   : > { %v1877_v22 = vpop.eup %1876 }
 0x9c7   : > { %v1029_v24 = vmul.f32 %v1877_v22, %v1873_v17 }
 0x9c9   : > { %v1030_v26 = vpack.c.bf16 %v1029_v24, %v1028_v23 }
 0x9cb   : > { %1762 = vmatmul.mubr.msk.bf16.vlgmr.msra.gmra.mrb[8].mxu0 %vm666_vm3, %v1030_v26 }
 0x9cc   : > { %1772 = vmatpush3.bf16.xpose.msra.mxu0 %v1137_v27  ;;  %1773 = vmatprep.mubr.msk.bf16.mxu0 %vm1903_vm1, %v1902_v16 }
 0x9cd   : > { %1783 = vmatprep.subr.bf16.mxu0 %v1902_v16 }
 0x9d3   : > { %1774 = vmatmul.mubr.msk.bf16.vlgmr.msra.gmra.mrb[12].mxu0 %vm618_vm2, %v1130_v28 }
 0x9d4   : > { %1785 = vmatprep.mubr.msk.bf16.mxu0 %vm1903_vm1, %v1902_v16  ;;  %1784 = vmatpush3.bf16.msra.mxu0 %v1256_v54 }
 0x9d5   : > { %1797 = vmatprep.subr.bf16.mxu0 %v1902_v16 }
 0xa9e   : > { %v1071_v31 = vpop.f32.mrb[8].mxu0 }
 0xa9f   : > { %v1763_v32 = vpop.f32.mrb[9].mxu0 }
 0xaa0   : > { %v1074_v33 = vpop.f32.mrb[10].mxu0 }
 0xaa1   : > { %v1078_v34 = vpack.c.bf16 %v1074_v33, %v1071_v31  ;;  %v1764_v35 = vpop.f32.mrb[11].mxu0  ;;  %v1840_v33 = vld [vmem:[%s2240_s9] sm:$0xff]  }
 0xaa2   : > { %v1842_v35 = vld [vmem:[%s2242_s11] sm:$0xff]  }
 0xaa3   : > { %1768 = vmatmul.mubr.msk.bf16.vlgmr.msra.gmra.mrb[24].mxu1 %vm618_vm2, %v1078_v34  ;;  %v1841_v34 = vld [vmem:[%s2240_s9 + $0x8] sm:$0xff]  }
 0xaa4   : > { %1779 = vmatprep.mubr.msk.bf16.mxu1 %vm1903_vm1, %v1902_v16 }
 0xaa6   : > { %v1173_v36 = vpop.f32.mrb[12].mxu0 }
 0xaa7   : > { %v1775_v37 = vpop.f32.mrb[13].mxu0  ;;  %v1180_v38 = vsel %vm666_vm3, %v1173_v36, -inf }
 0xaa8   : > { %1181 = vmax.xlane.f32.xlu1 %v1180_v38  ;;  %v1176_v39 = vpop.f32.mrb[14].mxu0 }
 0xaa9   : > { %v1776_v40 = vpop.f32.mrb[15].mxu0  ;;  %v1183_v41 = vsel %vm666_vm3, %v1176_v39, -inf }
 0xaaa   : > { %1184 = vmax.xlane.f32.xlu0 %v1183_v41 }
 0xb35   : > { %v1182_v43 = vpop.xlane.xlu1 %1181 }
 0xb36   : > { %v1186_v44 = vsub.f32 %v1173_v36, %v1182_v43  ;;  %v1843_v36 = vld [vmem:[%s2242_s11 + $0x8] sm:$0xff]  }
 0xb37   : > { %v1185_v45 = vpop.xlane.xlu0 %1184 }
 0xb38   : > { %v1188_v46 = vmul.f32 1.442695, %v1186_v44  ;;  %v1187_v47 = vsub.f32 %v1176_v39, %v1185_v45 }
 0xb3a   : > { %1878 = vpow2.f32 %v1188_v46  ;;  %v1190_v48 = vmul.f32 1.442695, %v1187_v47  ;;  %v1643_v46 = vld [vmem:[%s2238_s7] ss:$0 sm:$0xff] }
 0xb3c   : > { %1880 = vpow2.f32 %v1190_v48 }
 0xb44   : > { %v1879_v49 = vpop.eup %1878 }
 0xb45   : > { %v1192_v50 = vsel %vm666_vm3, %v1879_v49, 0.0 }
 0xb46   : > { %v1881_v51 = vpop.eup %1880  ;;  %1193 = vadd.xlane.f32.xlu0 %v1192_v50  ;;  %v1644_v50 = vld [vmem:[%s2239_s8] ss:$0 sm:$0xff] }
 0xb47   : > { %v1195_v52 = vsel %vm666_vm3, %v1881_v51, 0.0 }
 0xb48   : > { %1196 = vadd.xlane.f32.xlu1 %v1195_v52 }
 0xb5c   : > { %1203 = vrot.lane.b32.xlu0 %v2049_v42, %s1914_s20 }
 0xb76   : > { %v1120_v55 = vpop.f32.mrb[24].mxu1 }
 0xb77   : > { %v1127_v56 = vadd.f32 %v1120_v55, %v2106_v58  ;;  %v1769_v57 = vpop.f32.mrb[25].mxu1  ;;  %v1844_v55 = vld [vmem:[%s2242_s11 + $0x10] sm:$0xff]  }
 0xb78   : > { %v1123_v59 = vpop.f32.mrb[26].mxu1  ;;  %v1846_v57 = vld [vmem:[%s2242_s11 + $0x20] sm:$0xff]  }
 0xb79   : > { %v1128_v60 = vadd.f32 %v1123_v59, %v2108_v61  ;;  %v1770_v62 = vpop.f32.mrb[27].mxu1  ;;  %v1847_v59 = vld [vmem:[%s2242_s11 + $0x28] sm:$0xff]  }
 0xb7a   : > { %v1849_v62 = vld [vmem:[%s2242_s11 + $0x38] sm:$0xff]  }
 0xbd3   : > { %v1194_v63 = vpop.xlane.xlu0 %1193 }
 0xbd4   : > { %1882 = vrcp.f32 %v1194_v63  ;;  %v1645_v63 = vld [vmem:[%s2241_s10] ss:$0 sm:$0xff] }
 0xbd5   : > { %v1197_v42 = vpop.xlane.xlu1 %1196 }
 0xbd6   : > { %1884 = vrcp.f32 %v1197_v42 }
 0xbd7   : > { %v1204_v0 = vpop.permute.xlu0 %1203 }
 0xbd8   : > { %1778 = vmatpush3.bf16.msra.mxu1 %v1204_v0 }
 0xbd9   : > { %1789 = vmatprep.subr.bf16.mxu1 %v1902_v16 }
 0xbde   : > { %v1883_v3 = vpop.eup %1882 }
 0xbdf   : > { %v1200_v5 = vmul.f32 %v1883_v3, %v1879_v49 }
 0xbe0   : > { %v1885_v4 = vpop.eup %1884 }
 0xbe1   : > { %v1201_v6 = vmul.f32 %v1885_v4, %v1881_v51 }
 0xbe3   : > { %v1202_v7 = vpack.c.bf16 %v1201_v6, %v1200_v5 }
 0xbe5   : > { %1780 = vmatmul.mubr.msk.bf16.vlgmr.msra.gmra.mrb[28].mxu1 %vm666_vm3, %v1202_v7 }
 0xbe6   : > { %1793 = vmatprep.mubr.msk.bf16.mxu1 %vm1903_vm1, %v1902_v16  ;;  %1790 = vmatpush3.bf16.msra.mxu1 %v1840_v33 }
 0xbe7   : > { %1791 = vmatprep.subr.bf16.mxu1 %v1902_v16 }
 0xbea   : > { %1792 = vmatpush3.bf16.msra.mxu1 %v1841_v34 }
 0xcb8   : > { %v1243_v58 = vpop.f32.mrb[28].mxu1 }
 0xcb9   : > { %v1781_v61 = vpop.f32.mrb[29].mxu1 }
 0xcba   : > { %v1246_v8 = vpop.f32.mrb[30].mxu1 }
 0xcbb   : > { %v1250_v9 = vpack.c.bf16 %v1246_v8, %v1243_v58  ;;  %v1782_v10 = vpop.f32.mrb[31].mxu1 }
 0xcbd   : > { %1786 = vmatmul.mubr.msk.bf16.vlgmr.msra.gmra.mrb[16].mxu0 %vm618_vm2, %v1250_v9 }
 0xcbe   : > { %1813 = vmatprep.mubr.msk.bf16.mxu0 %vm1903_vm1, %v1902_v16  ;;  %1798 = vmatpush3.bf16.msra.mxu0 %v1842_v35 }
 0xcbf   : > { %1799 = vmatprep.subr.bf16.mxu0 %v1902_v16 }
 0xcc2   : > { %1800 = vmatpush3.bf16.msra.mxu0 %v1843_v36 }
 0xcc3   : > { %1801 = vmatprep.subr.bf16.mxu0 %v1902_v16 }
 0xcc6   : > { %1802 = vmatpush3.bf16.msra.mxu0 %v1844_v55 }
 0xcc7   : > { %1803 = vmatprep.subr.bf16.mxu0 %v1902_v16 }
 0xd90   : > { %v1292_v11 = vpop.f32.mrb[16].mxu0 }
 0xd91   : > { %v1299_v12 = vadd.f32 %v1292_v11, %v1127_v56  ;;  %v1787_v13 = vpop.f32.mrb[17].mxu0  ;;  %v1845_v56 = vld [vmem:[%s2242_s11 + $0x18] sm:$0xff]  }
 0xd92   : > { %v1295_v15 = vpop.f32.mrb[18].mxu0  ;;  %1804 = vmatpush3.bf16.msra.mxu0 %v1845_v56 }
 0xd93   : > { %v1301_v17 = vadd.f32 %v2011_v1, %v1299_v12  ;;  %v1300_v18 = vadd.f32 %v1295_v15, %v1128_v60  ;;  %v1788_v19 = vpop.f32.mrb[19].mxu0  ;;  %1805 = vmatprep.subr.bf16.mxu0 %v1902_v16  ;;  %v1848_v60 = vld [vmem:[%s2242_s11 + $0x30] sm:$0xff]   ;;  %v1649_v15 = vld [vmem:[%s2243_s12] ss:$0 sm:$0xff] }
 0xd95   : > { %v2157_v20 = vadd.f32 %v1642_v14, %v1301_v17  ;;  %v1302_v21 = vadd.f32 %v2013_v2, %v1300_v18 }
 0xd96   : > { %1806 = vmatpush3.bf16.msra.mxu0 %v1846_v57 }
 0xd97   : > { %v2160_v22 = vadd.f32 %v1642_v14, %v1302_v21  ;;  %v1314_v23 = vsel %vm502_vm0, %v2157_v20, 0.0  ;;  %1807 = vmatprep.subr.bf16.mxu0 %v1902_v16 }
 0xd98   : > { %1315 = vadd.xlane.f32.xlu1 %v1314_v23 }
 0xd99   : > { %v1317_v24 = vsel %vm502_vm0, %v2160_v22, 0.0 }
 0xd9a   : > { %1808 = vmatpush3.bf16.msra.mxu0 %v1847_v59 }
 0xd9b   : > { %1809 = vmatprep.subr.bf16.mxu0 %v1902_v16 }
 0xd9c   : > { %1318 = vadd.xlane.f32.xlu1 %v1317_v24 }
 0xd9e   : > { %1810 = vmatpush3.bf16.msra.mxu0 %v1848_v60 }
 0xd9f   : > { %1811 = vmatprep.subr.bf16.mxu0 %v1902_v16 }
 0xda2   : > { %1812 = vmatpush3.bf16.msra.mxu0 %v1849_v62 }
 0xe25   : > { %v1316_v25 = vpop.xlane.xlu1 %1315 }
 0xe26   : > { %v1320_v26 = vmul.f32 0.03125, %v1316_v25 }
 0xe28   : > { %v1322_v1 = vsub.f32 %v2157_v20, %v1320_v26 }
 0xe29   : > { %v1319_v27 = vpop.xlane.xlu1 %1318 }
 0xe2a   : > { %v1321_v28 = vmul.f32 0.03125, %v1319_v27  ;;  %v1324_v29 = vmul.f32 %v1322_v1, %v1322_v1 }
 0xe2c   : > { %v1323_v30 = vsub.f32 %v2160_v22, %v1321_v28  ;;  %v1326_v2 = vsel %vm502_vm0, %v1324_v29, 0.0 }
 0xe2d   : > { %1327 = vadd.xlane.f32.xlu1 %v1326_v2 }
 0xe2e   : > { %v1325_v31 = vmul.f32 %v1323_v30, %v1323_v30 }
 0xe30   : > { %v1329_v32 = vsel %vm502_vm0, %v1325_v31, 0.0 }
 0xe31   : > { %1330 = vadd.xlane.f32.xlu1 %v1329_v32 }
 0xeba   : > { %v1328_v37 = vpop.xlane.xlu1 %1327 }
 0xebb   : > { %v1332_v38 = vmul.f32 0.03125, %v1328_v37 }
 0xebd   : > { %v1334_v39 = vadd.f32 1e-05, %v1332_v38 }
 0xebe   : > { %v1331_v40 = vpop.xlane.xlu1 %1330 }
 0xebf   : > { %1886 = vrsqrt.f32 %v1334_v39  ;;  %v1333_v41 = vmul.f32 0.03125, %v1331_v40 }
 0xec1   : > { %v1335_v43 = vadd.f32 1e-05, %v1333_v41 }
 0xec3   : > { %1888 = vrsqrt.f32 %v1335_v43 }
 0xec9   : > { %v1887_v44 = vpop.eup %1886 }
 0xeca   : > { %v1338_v45 = vmul.f32 %v1887_v44, %v1322_v1 }
 0xecc   : > { %v1346_v48 = vmul.f32 %v1643_v46, %v1338_v45 }
 0xecd   : > { %v1889_v47 = vpop.eup %1888 }
 0xece   : > { %v1339_v49 = vmul.f32 %v1889_v47, %v1323_v30  ;;  %v1354_v52 = vadd.f32 %v1644_v50, %v1346_v48 }
 0xed0   : > { %v1347_v51 = vmul.f32 %v1643_v46, %v1339_v49 }
 0xed2   : > { %v1355_v53 = vadd.f32 %v1644_v50, %v1347_v51 }
 0xed4   : > { %v1356_v54 = vpack.c.bf16 %v1355_v53, %v1354_v52 }
 0xed6   : > { %1794 = vmatmul.mubr.msk.bf16.vlgmr.msra.gmra.mrb[32].mxu1 %vm502_vm0, %v1356_v54 }
 0xfa9   : > { %v1417_v42 = vpop.f32.mrb[32].mxu1 }
 0xfaa   : > { %v1418_v0 = vadd.f32 %v1645_v63, %v1417_v42  ;;  %v1795_v3 = vpop.f32.mrb[33].mxu1 }
 0xfab   : > { %v1420_v4 = vpop.f32.mrb[34].mxu1 }
 0xfac   : > { %v1426_v5 = vmul.f32 0.70710677, %v1418_v0  ;;  %v1421_v6 = vadd.f32 %v1645_v63, %v1420_v4  ;;  %v1796_v7 = vpop.f32.mrb[35].mxu1  ;;  %v1424_v9 = vmul.f32 0.5, %v1418_v0 }
 0xfae   : > { %1890 = verf.f32 %v1426_v5  ;;  %v1427_v58 = vmul.f32 0.70710677, %v1421_v6  ;;  %v1425_v10 = vmul.f32 0.5, %v1421_v6 }
 0xfb0   : > { %1892 = verf.f32 %v1427_v58 }
 0xfb8   : > { %v1891_v16 = vpop.eup %1890 }
 0xfb9   : > { %v1430_v61 = vadd.f32 1.0, %v1891_v16 }
 0xfba   : > { %v1893_v8 = vpop.eup %1892 }
 0xfbb   : > { %v1431_v11 = vadd.f32 1.0, %v1893_v8  ;;  %v1432_v12 = vmul.f32 %v1430_v61, %v1424_v9 }
 0xfbd   : > { %v1433_v13 = vmul.f32 %v1431_v11, %v1425_v10 }
 0xfbf   : > { %v1434_v14 = vpack.c.bf16 %v1433_v13, %v1432_v12 }
 0xfc1   : > { %1814 = vmatmul.mubr.bf16.vlgmr.msra.gmra.mrb[20].mxu0 %v1434_v14 }
0x1094   : > { %v1540_v17 = vpop.f32.mrb[20].mxu0 }
0x1095   : > { %v1541_v18 = vadd.f32 %v1649_v15, %v1540_v17  ;;  %v1815_v19 = vpop.f32.mrb[21].mxu0 }
0x1096   : > { %v1543_v21 = vpop.f32.mrb[22].mxu0 }
0x1097   : > { %v1547_v23 = vadd.f32 %v1541_v18, %v2157_v20  ;;  %v1544_v24 = vadd.f32 %v1649_v15, %v1543_v21  ;;  %v1816_v25 = vpop.f32.mrb[23].mxu0 }
0x1099   : > { %v1664_v26 = vpack.c.bf16 %v1547_v23, %v1547_v23  ;;  %v1548_v1 = vadd.f32 %v1544_v24, %v2160_v22 }
0x109b   : > { %1558 = vst.msk [vmem:[%s494_s27] sm:$0xf] %vm1557_vm5, %v1664_v26  ;;  %v1665_v27 = vpack.c.bf16 %v1548_v1, %v1548_v1 }
0x109d   : > { %1559 = vst.msk [vmem:[%s494_s27 + $0x4] sm:$0xf] %vm1557_vm5, %v1665_v27 }
0x109e PF: > { %s25_s18 = sadd.s32 1, %s1900_s18  }
0x109f   : > { %p22_p4 = scmp.ge.s32.totalorder %s25_s18, 4  }
0x10a1   :  { %24 = sbr.rel (!%p22_p4) target bundleno = 1 (0x1), region = 110 }

// kernel: vision_transformer2_forward.3
= control target key start
LH: loop header
LB: loop body
LE: loop exit
PB: predicated region body
PF: predicated region fallthrough
CT: control target
= control target key end

     0   :  { %s2471_s0 = inlined_call_operand.vmem [shape: bf16[2,16,32], index: 0, kind: input, shape index: {}]   ;;  %s2472_s1 = inlined_call_operand.vmem [shape: f32[1,32], index: 1, kind: input, shape index: {}]   ;;  %s2473_s2 = inlined_call_operand.vmem [shape: f32[1,32], index: 2, kind: input, shape index: {}]   ;;  %s2474_s3 = inlined_call_operand.vmem [shape: bf16[32,96], index: 3, kind: input, shape index: {}]   ;;  %s2475_s4 = inlined_call_operand.vmem [shape: f32[1,96], index: 4, kind: input, shape index: {}]   ;;  %s2476_s5 = inlined_call_operand.vmem [shape: bf16[32,32], index: 5, kind: input, shape index: {}]   ;;  %s2477_s6 = inlined_call_operand.vmem [shape: f32[1,32], index: 6, kind: input, shape index: {}]   ;;  %s2478_s7 = inlined_call_operand.vmem [shape: f32[1,32], index: 7, kind: input, shape index: {}]   ;;  %s2479_s8 = inlined_call_operand.vmem [shape: f32[1,32], index: 8, kind: input, shape index: {}]   ;;  %s2480_s9 = inlined_call_operand.vmem [shape: bf16[32,128], index: 9, kind: input, shape index: {}]   ;;  %s2481_s10 = inlined_call_operand.vmem [shape: f32[1,128], index: 10, kind: input, shape index: {}]   ;;  %s2482_s11 = inlined_call_operand.vmem [shape: bf16[128,32], index: 11, kind: input, shape index: {}]   ;;  %s2483_s12 = inlined_call_operand.vmem [shape: f32[1,32], index: 12, kind: input, shape index: {}]   ;;  %s2484_s13 = inlined_call_operand.vmem [shape: f32[1,32], index: 13, kind: input, shape index: {}]   ;;  %s2485_s14 = inlined_call_operand.vmem [shape: f32[1,32], index: 14, kind: input, shape index: {}]   ;;  %s2486_s15 = inlined_call_operand.hbm [shape: f32[2,16,32], index: 15, kind: output, shape index: {}]  }
   0x1   :  { %2487 = sst [smem:[#allocation5_spill]] %s2471_s0 }
   0x2   :  { %2488 = sst [smem:[#allocation6_spill]] %s2472_s1 }
   0x3   :  { %2489 = sst [smem:[#allocation7_spill]] %s2473_s2 }
   0x4   :  { %2490 = sst [smem:[#allocation8_spill]] %s2474_s3 }
   0x5   :  { %20 = vsyncpa [#allocation3], 0 }
   0x6   :  { %22 = vsyncpa [#allocation3 + $0x1], 0  ;;  %s2144_s18 = smov 0   ;;  %s2146_s19 = smov 0  }
   0x7   :  { %s2148_s20 = smov 0   ;;  %s2150_s21 = smov 0  }
   0x8 LB: > { %s2165_s22 = sadd.s32 4294967295, %s2046_s21   ;;  %s1669_s23 = sadd.s32 4294967294, %s2046_s21   ;;  %s2046_s21 = sphi %s2150_s21, %s2500_s21   ;;  %s2042_s20 = sphi %s2148_s20, %s2499_s20   ;;  %s2038_s19 = sphi %s2146_s19, %s2498_s19   ;;  %s2034_s18 = sphi %s2144_s18, %s2497_s18  }
   0x9   : > { %s2169_s24 = sadd.s32 1, %s2046_s21   ;;  %s355_s25 = sadd.s32 1, %s2042_s20 }
   0xa   : > { %s352_s26 = ssub.s32 %s2046_s21, %s2169_s24  ;;  %p365_p0 = scmp.ne.s32.totalorder %s2042_s20, %s2038_s19 }
   0xb   : > { %p353_p1 = scmp.eq.s32.totalorder %s352_s26, 0  ;;  %p366_p2 = scmp.eq.s32.totalorder %s2165_s22, 1 }
   0xc   : > { %p371_p3 = scmp.ne.s32.totalorder %s2038_s19, %s2034_s18  ;;  %p372_p4 = scmp.eq.s32.totalorder %s1669_s23, 1 }
   0xd   : > { %s2180_s27 = scalar_select %p353_p1, %s2042_s20, %s355_s25  }
   0xe   : > { %p2182_p5 = por %p366_p2, %p365_p0  ;;  %p2186_p6 = por %p372_p4, %p371_p3 }
   0xf   : > { %p1672_p7 = scmp.ge.s32.totalorder %s2046_s21, 1  ;;  %p440_p8 = scmp.lt.s32.totalorder %s2046_s21, 3 }
  0x11   : > { %p441_p9 = pnand %p1672_p7, %p440_p8 }
  0x12   : > { %p488_p10 = scmp.lt.s32.totalorder (!%p441_p9), %s2165_s22, 1  ;;  %s2493_s0 = sld [smem:[#allocation5_spill]] (!%p441_p9)  ;;  %vm500_vm0 = vcmask (!%p441_p9), 261120   ;;  %v2048_v16 = vmov (!%p441_p9), 0.0   ;;  %vm2049_vm1 = vmmov (!%p441_p9), 0   ;;  %vm616_vm2 = vcmask (!%p441_p9), 64512  }
  0x13   : > { %444 = sbr.rel (%p441_p9) target bundleno = 4595 (0x11f3), region = 80  ;;  %s2494_s3 = sld [smem:[#allocation8_spill]] (!%p441_p9)  ;;  %1762 = vmatprep.subr.bf16.mxu1 (!%p441_p9), %v2048_v16  ;;  %1788 = vmatprep.subr.bf16.mxu0 (!%p441_p9), %v2048_v16  ;;  %v1678_v35 = vld [vmem:[%s2475_s4] ss:$0 sm:$0xff] (!%p441_p9)  ;;  %vm664_vm3 = vcmask (!%p441_p9), 130048   ;;  %vm863_vm4 = vcmask (!%p441_p9), 1043456  }
  0x14   : > { %1766 = vmatprep.mubr.msk.bf16.mxu1 (!%p441_p9), %vm2049_vm1, %v2048_v16  ;;  %1790 = vmatprep.mubr.msk.bf16.mxu0 (!%p441_p9), %vm2049_vm1, %v2048_v16  ;;  %s2495_s1 = sld [smem:[#allocation6_spill]] (!%p441_p9)  ;;  %s2496_s2 = sld [smem:[#allocation7_spill]] (!%p441_p9) }
  0x15   : > { %s2050_s23 = smov (!%p441_p9), 96   ;;  %s2052_s26 = smov (!%p441_p9), 120  }
  0x16   : > { %s2055_s17 = smov (!%p441_p9), 112  }
  0x19   : > { %v1924_v15 = vld [vmem:[%s2494_s3] sm:$0xff] (!%p441_p9)   ;;  %v1925_v17 = vld [vmem:[%s2494_s3 + $0x8] sm:$0xff] (!%p441_p9)  }
  0x1a   : > { %s489_s30 = scalar_select %p488_p10, %s2165_s22, 1  ;;  %1763 = vmatpush3.bf16.msra.mxu1 %v1924_v15  ;;  %v1676_v26 = vld [vmem:[%s2495_s1] ss:$0 sm:$0xff] }
  0x1b   : > { %1764 = vmatprep.subr.bf16.mxu1 %v2048_v16  ;;  %v1677_v30 = vld [vmem:[%s2496_s2] ss:$0 sm:$0xff] }
  0x1c   : > { %s1717_s16 = sshll.u32 %s489_s30, 3  ;;  %s2053_s30 = smov 64  }
  0x1d   : > { %s492_s25 = scalar_lea.vmem %s2493_s0, %s1717_s16  ;;  %s2054_s16 = smov 80  }
  0x1e   : > { %v1720_v0 = vld [vmem:[%s492_s25] sm:$0xff]   ;;  %1765 = vmatpush3.bf16.msra.mxu1 %v1925_v17  ;;  %s2051_s25 = smov 88   ;;  %s1718_s0 = sshll.u32 %s2165_s22, 8 }
  0x1f   : > { %v2197_v1 = vunpack.c.l.bf16 %v1720_v0  ;;  %v2199_v2 = vunpack.c.h.bf16 %v1720_v0  ;;  %1770 = vmatprep.subr.bf16.mxu1 %v2048_v16 }
  0x21   : > { %v501_v3 = vsel %vm500_vm0, %v2197_v1, 0.0  ;;  %v504_v4 = vsel %vm500_vm0, %v2199_v2, 0.0 }
  0x22   : > { %502 = vadd.xlane.f32.xlu0 %v501_v3 }
  0x26   : > { %505 = vadd.xlane.f32.xlu0 %v504_v4 }
  0xaf   : > { %v503_v5 = vpop.xlane.xlu0 %502 }
  0xb0   : > { %v508_v6 = vmul.f32 0.03125, %v503_v5 }
  0xb2   : > { %v510_v7 = vsub.f32 %v2197_v1, %v508_v6 }
  0xb3   : > { %v506_v8 = vpop.xlane.xlu0 %505 }
  0xb4   : > { %v509_v9 = vmul.f32 0.03125, %v506_v8  ;;  %v512_v10 = vmul.f32 %v510_v7, %v510_v7 }
  0xb6   : > { %v511_v11 = vsub.f32 %v2199_v2, %v509_v9  ;;  %v514_v12 = vsel %vm500_vm0, %v512_v10, 0.0 }
  0xb7   : > { %515 = vadd.xlane.f32.xlu1 %v514_v12 }
  0xb8   : > { %v513_v13 = vmul.f32 %v511_v11, %v511_v11 }
  0xba   : > { %v517_v14 = vsel %vm500_vm0, %v513_v13, 0.0 }
  0xbb   : > { %518 = vadd.xlane.f32.xlu1 %v517_v14 }
 0x144   : > { %v516_v18 = vpop.xlane.xlu1 %515 }
 0x145   : > { %v520_v19 = vmul.f32 0.03125, %v516_v18 }
 0x147   : > { %v522_v20 = vadd.f32 1e-05, %v520_v19 }
 0x148   : > { %v519_v21 = vpop.xlane.xlu1 %518 }
 0x149   : > { %1936 = vrsqrt.f32 %v522_v20  ;;  %v521_v22 = vmul.f32 0.03125, %v519_v21 }
 0x14b   : > { %v523_v23 = vadd.f32 1e-05, %v521_v22 }
 0x14d   : > { %1938 = vrsqrt.f32 %v523_v23 }
 0x153   : > { %v1937_v24 = vpop.eup %1936 }
 0x154   : > { %v526_v25 = vmul.f32 %v1937_v24, %v510_v7 }
 0x156   : > { %v534_v29 = vmul.f32 %v1676_v26, %v526_v25 }
 0x157   : > { %v1939_v27 = vpop.eup %1938 }
 0x158   : > { %v527_v28 = vmul.f32 %v1939_v27, %v511_v11  ;;  %v542_v32 = vadd.f32 %v1677_v30, %v534_v29 }
 0x15a   : > { %v535_v31 = vmul.f32 %v1676_v26, %v527_v28 }
 0x15c   : > { %v543_v33 = vadd.f32 %v1677_v30, %v535_v31 }
 0x15e   : > { %v544_v34 = vpack.c.bf16 %v543_v33, %v542_v32  ;;  %v859_v32 = vld [vmem:[%s2476_s5 + $0x4] sm:$0xf] }
 0x15f   : > { %v865_v33 = vsel %vm863_vm4, %v859_v32, 0 }
 0x160   : > { %1767 = vmatmul.mubr.msk.bf16.vlgmr.msra.gmra.mrb[0].mxu1 %vm500_vm0, %v544_v34 }
 0x161   : > { %1772 = vmatprep.mubr.msk.bf16.mxu1 %vm2049_vm1, %v2048_v16 }
 0x233   : > { %v605_v36 = vpop.f32.mrb[0].mxu1 }
 0x234   : > { %v1768_v37 = vpop.f32.mrb[1].mxu1  ;;  %v606_v39 = vadd.f32 %v1678_v35, %v605_v36 }
 0x235   : > { %v608_v38 = vpop.f32.mrb[2].mxu1 }
 0x236   : > { %v609_v40 = vadd.f32 %v1678_v35, %v608_v38  ;;  %v1769_v41 = vpop.f32.mrb[3].mxu1 }
 0x238   : > { %v2235_v42 = vpack.c.bf16 %v609_v40, %v606_v39  ;;  %v736_v39 = vld [vmem:[%s2476_s5] sm:$0xf] }
 0x23a   : > { %614 = vrot.lane.b32.xlu0 %v2235_v42, %s2050_s23  ;;  %s2056_s23 = smov 56  }
 0x23e   : > { %739 = vrot.lane.b32.xlu0 %v2235_v42, %s2051_s25  ;;  %s2059_s25 = smov 72  }
 0x242   : > { %737 = vrot.lane.b32.xlu0 %v2235_v42, %s2052_s26 }
 0x2ac   : > { %v615_v43 = vpop.permute.xlu0 %614 }
 0x2ad   : > { %v621_v44 = vsel %vm616_vm2, %v615_v43, 0 }
 0x2ae   : > { %1771 = vmatpush3.bf16.xpose.msra.mxu1 %v621_v44  ;;  %v912_v44 = vsel %vm863_vm4, %v736_v39, 0 }
 0x2af   : > { %1776 = vmatprep.subr.bf16.mxu1 %v2048_v16 }
 0x2b0   : > { %v740_v6 = vpop.permute.xlu0 %739 }
 0x2b1   : > { %v745_v8 = vsel %vm616_vm2, %v740_v6, 0 }
 0x2b4   : > { %v738_v9 = vpop.permute.xlu0 %737 }
 0x2b5   : > { %1773 = vmatmul.mubr.msk.bf16.vlgmr.msra.gmra.mrb[4].mxu1 %vm616_vm2, %v2235_v42 }
 0x2b6   : > { %1778 = vmatprep.mubr.msk.bf16.mxu1 %vm2049_vm1, %v2048_v16 }
 0x388   : > { %v657_v45 = vpop.f32.mrb[4].mxu1 }
 0x389   : > { %v1774_v46 = vpop.f32.mrb[5].mxu1  ;;  %v665_v47 = vsel %vm664_vm3, %v657_v45, -inf }
 0x38a   : > { %666 = vmax.xlane.f32.xlu1 %v665_v47  ;;  %v660_v48 = vpop.f32.mrb[6].mxu1 }
 0x38b   : > { %v1775_v49 = vpop.f32.mrb[7].mxu1  ;;  %v668_v50 = vsel %vm664_vm3, %v660_v48, -inf }
 0x38e   : > { %669 = vmax.xlane.f32.xlu1 %v668_v50 }
 0x417   : > { %v667_v51 = vpop.xlane.xlu1 %666 }
 0x418   : > { %v671_v52 = vsub.f32 %v657_v45, %v667_v51 }
 0x41a   : > { %v673_v53 = vmul.f32 1.442695, %v671_v52 }
 0x41b   : > { %v670_v54 = vpop.xlane.xlu1 %669 }
 0x41c   : > { %1940 = vpow2.f32 %v673_v53  ;;  %v672_v55 = vsub.f32 %v660_v48, %v670_v54 }
 0x41e   : > { %v675_v56 = vmul.f32 1.442695, %v672_v55 }
 0x420   : > { %1942 = vpow2.f32 %v675_v56 }
 0x426   : > { %v1941_v57 = vpop.eup %1940 }
 0x427   : > { %v677_v58 = vsel %vm664_vm3, %v1941_v57, 0.0 }
 0x428   : > { %678 = vadd.xlane.f32.xlu1 %v677_v58 }
 0x42a   : > { %v1943_v59 = vpop.eup %1942 }
 0x42b   : > { %v680_v60 = vsel %vm664_vm3, %v1943_v59, 0.0 }
 0x42c   : > { %681 = vadd.xlane.f32.xlu1 %v680_v60 }
 0x43d   : > { %688 = vrot.lane.b32.xlu1 %v2235_v42, %s2053_s30 }
 0x4b5   : > { %v679_v61 = vpop.xlane.xlu1 %678 }
 0x4b6   : > { %1944 = vrcp.f32 %v679_v61 }
 0x4b9   : > { %v682_v62 = vpop.xlane.xlu1 %681 }
 0x4ba   : > { %1946 = vrcp.f32 %v682_v62 }
 0x4bd   : > { %v689_v63 = vpop.permute.xlu1 %688 }
 0x4be   : > { %1777 = vmatpush3.bf16.msra.mxu1 %v689_v63 }
 0x4bf   : > { %1782 = vmatprep.subr.bf16.mxu1 %v2048_v16 }
 0x4c0   : > { %v1945_v0 = vpop.eup %1944 }
 0x4c1   : > { %v685_v4 = vmul.f32 %v1945_v0, %v1941_v57 }
 0x4c4   : > { %v1947_v3 = vpop.eup %1946 }
 0x4c5   : > { %v686_v5 = vmul.f32 %v1947_v3, %v1943_v59 }
 0x4c7   : > { %v687_v7 = vpack.c.bf16 %v686_v5, %v685_v4 }
 0x4c9   : > { %1779 = vmatmul.mubr.msk.bf16.vlgmr.msra.gmra.mrb[8].mxu1 %vm664_vm3, %v687_v7 }
 0x4ca   : > { %1783 = vmatpush3.bf16.xpose.msra.mxu1 %v745_v8  ;;  %1784 = vmatprep.mubr.msk.bf16.mxu1 %vm2049_vm1, %v2048_v16 }
 0x4cb   : > { %1794 = vmatprep.subr.bf16.mxu1 %v2048_v16 }
 0x4d1   : > { %1785 = vmatmul.mubr.msk.bf16.vlgmr.msra.gmra.mrb[12].mxu1 %vm616_vm2, %v738_v9 }
 0x4d2   : > { %1796 = vmatprep.mubr.msk.bf16.mxu1 %vm2049_vm1, %v2048_v16  ;;  %1795 = vmatpush3.bf16.msra.mxu1 %v865_v33 }
 0x4d3   : > { %1806 = vmatprep.subr.bf16.mxu1 %v2048_v16 }
 0x59c   : > { %v728_v10 = vpop.f32.mrb[8].mxu1 }
 0x59d   : > { %v1780_v11 = vpop.f32.mrb[9].mxu1 }
 0x59e   : > { %v731_v12 = vpop.f32.mrb[10].mxu1 }
 0x59f   : > { %v735_v13 = vpack.c.bf16 %v731_v12, %v728_v10  ;;  %v1781_v14 = vpop.f32.mrb[11].mxu1 }
 0x5a4   : > { %v781_v15 = vpop.f32.mrb[12].mxu1 }
 0x5a5   : > { %v1786_v17 = vpop.f32.mrb[13].mxu1  ;;  %v788_v18 = vsel %vm664_vm3, %v781_v15, -inf }
 0x5a6   : > { %789 = vmax.xlane.f32.xlu0 %v788_v18  ;;  %v784_v19 = vpop.f32.mrb[14].mxu1 }
 0x5a7   : > { %v1787_v20 = vpop.f32.mrb[15].mxu1  ;;  %v791_v21 = vsel %vm664_vm3, %v784_v19, -inf }
 0x5a8   : > { %792 = vmax.xlane.f32.xlu1 %v791_v21 }
 0x5b9   : > { %957 = vrot.lane.b32.xlu1 %v2235_v42, %s2054_s16  ;;  %s2060_s16 = smov 40  }
 0x5bd   : > { %955 = vrot.lane.b32.xlu1 %v2235_v42, %s2055_s17  ;;  %s2057_s17 = smov 48  }
 0x633   : > { %v790_v22 = vpop.xlane.xlu0 %789 }
 0x634   : > { %v794_v23 = vsub.f32 %v781_v15, %v790_v22 }
 0x635   : > { %v793_v24 = vpop.xlane.xlu1 %792 }
 0x636   : > { %v796_v25 = vmul.f32 1.442695, %v794_v23  ;;  %v795_v26 = vsub.f32 %v784_v19, %v793_v24 }
 0x638   : > { %1948 = vpow2.f32 %v796_v25  ;;  %v798_v27 = vmul.f32 1.442695, %v795_v26 }
 0x639   : > { %v958_v47 = vpop.permute.xlu1 %957 }
 0x63a   : > { %1950 = vpow2.f32 %v798_v27  ;;  %v963_v51 = vsel %vm616_vm2, %v958_v47, 0 }
 0x63d   : > { %v956_v56 = vpop.permute.xlu1 %955 }
 0x642   : > { %v1949_v28 = vpop.eup %1948 }
 0x643   : > { %v800_v29 = vsel %vm664_vm3, %v1949_v28, 0.0 }
 0x644   : > { %v1951_v30 = vpop.eup %1950  ;;  %801 = vadd.xlane.f32.xlu0 %v800_v29  ;;  %v1077_v29 = vld [vmem:[%s2476_s5 + $0x8] sm:$0xf] }
 0x645   : > { %v803_v31 = vsel %vm664_vm3, %v1951_v30, 0.0 }
 0x648   : > { %804 = vadd.xlane.f32.xlu0 %v803_v31 }
 0x65e   : > { %811 = vrot.lane.b32.xlu0 %v2235_v42, %s2056_s23  ;;  %s2058_s23 = smov 104  }
 0x6d1   : > { %v802_v34 = vpop.xlane.xlu0 %801 }
 0x6d2   : > { %1952 = vrcp.f32 %v802_v34 }
 0x6d5   : > { %v805_v35 = vpop.xlane.xlu0 %804 }
 0x6d6   : > { %1954 = vrcp.f32 %v805_v35 }
 0x6d9   : > { %v812_v36 = vpop.permute.xlu0 %811 }
 0x6da   : > { %1789 = vmatpush3.bf16.msra.mxu0 %v812_v36 }
 0x6db   : > { %1800 = vmatprep.subr.bf16.mxu0 %v2048_v16 }
 0x6dc   : > { %v1953_v37 = vpop.eup %1952 }
 0x6dd   : > { %v808_v40 = vmul.f32 %v1953_v37, %v1949_v28 }
 0x6e0   : > { %v1955_v38 = vpop.eup %1954 }
 0x6e1   : > { %v809_v41 = vmul.f32 %v1955_v38, %v1951_v30  ;;  %v1082_v30 = vsel %vm863_vm4, %v1077_v29, 0 }
 0x6e3   : > { %v810_v43 = vpack.c.bf16 %v809_v41, %v808_v40 }
 0x6e5   : > { %1791 = vmatmul.mubr.msk.bf16.vlgmr.msra.gmra.mrb[0].mxu0 %vm664_vm3, %v810_v43 }
 0x6e6   : > { %1801 = vmatpush3.bf16.msra.mxu0 %v912_v44  ;;  %1802 = vmatprep.mubr.msk.bf16.mxu0 %vm2049_vm1, %v2048_v16 }
 0x6e7   : > { %1812 = vmatprep.subr.bf16.mxu0 %v2048_v16 }
 0x6ed   : > { %1803 = vmatmul.mubr.msk.bf16.vlgmr.msra.gmra.mrb[4].mxu0 %vm616_vm2, %v735_v13 }
 0x6ee   : > { %1814 = vmatprep.mubr.msk.bf16.mxu0 %vm2049_vm1, %v2048_v16 }
 0x7b8   : > { %v851_v45 = vpop.f32.mrb[0].mxu0 }
 0x7b9   : > { %v1792_v46 = vpop.f32.mrb[1].mxu0 }
 0x7ba   : > { %v854_v48 = vpop.f32.mrb[2].mxu0 }
 0x7bb   : > { %v858_v49 = vpack.c.bf16 %v854_v48, %v851_v45  ;;  %v1793_v50 = vpop.f32.mrb[3].mxu0 }
 0x7bd   : > { %1797 = vmatmul.mubr.msk.bf16.vlgmr.msra.gmra.mrb[16].mxu1 %vm616_vm2, %v858_v49 }
 0x7be   : > { %1807 = vmatpush3.bf16.xpose.msra.mxu1 %v963_v51  ;;  %1808 = vmatprep.mubr.msk.bf16.mxu1 %vm2049_vm1, %v2048_v16 }
 0x7bf   : > { %1818 = vmatprep.subr.bf16.mxu1 %v2048_v16 }
 0x7c0   : > { %v948_v52 = vpop.f32.mrb[4].mxu0 }
 0x7c1   : > { %v1804_v53 = vpop.f32.mrb[5].mxu0 }
 0x7c2   : > { %v951_v54 = vpop.f32.mrb[6].mxu0  ;;  %v1249_v53 = vld [vmem:[%s2476_s5 + $0xc] sm:$0xf] }
 0x7c3   : > { %v1805_v55 = vpop.f32.mrb[7].mxu0 }
 0x7c5   : > { %1809 = vmatmul.mubr.msk.bf16.vlgmr.msra.gmra.mrb[20].mxu1 %vm616_vm2, %v956_v56 }
 0x7c6   : > { %1820 = vmatprep.mubr.msk.bf16.mxu1 %vm2049_vm1, %v2048_v16  ;;  %1819 = vmatpush3.bf16.msra.mxu1 %v1082_v30 }
 0x7c7   : > { %1830 = vmatprep.subr.bf16.mxu1 %v2048_v16 }
 0x890   : > { %v901_v57 = vpop.f32.mrb[16].mxu1 }
 0x891   : > { %v2292_v58 = vadd.f32 %v948_v52, %v901_v57  ;;  %v1798_v59 = vpop.f32.mrb[17].mxu1 }
 0x892   : > { %v904_v60 = vpop.f32.mrb[18].mxu1 }
 0x893   : > { %v2294_v61 = vadd.f32 %v951_v54, %v904_v60  ;;  %v1799_v62 = vpop.f32.mrb[19].mxu1  ;;  %v1254_v54 = vsel %vm863_vm4, %v1249_v53, 0 }
 0x898   : > { %v999_v63 = vpop.f32.mrb[20].mxu1 }
 0x899   : > { %v1810_v0 = vpop.f32.mrb[21].mxu1  ;;  %v1006_v3 = vsel %vm664_vm3, %v999_v63, -inf }
 0x89a   : > { %1007 = vmax.xlane.f32.xlu1 %v1006_v3  ;;  %v1002_v4 = vpop.f32.mrb[22].mxu1 }
 0x89b   : > { %v1811_v5 = vpop.f32.mrb[23].mxu1  ;;  %v1009_v6 = vsel %vm664_vm3, %v1002_v4, -inf }
 0x89c   : > { %1010 = vmax.xlane.f32.xlu0 %v1009_v6 }
 0x8ab   : > { %1029 = vrot.lane.b32.xlu1 %v2235_v42, %s2057_s17  ;;  %s485_s17 = sand.u32 1, %s2038_s19  }
 0x8ac   : > { %s1673_s26 = sshll.u32 %s485_s17, 4  ;;  %s2430_s30 = scalar_lea.sflag [#allocation3], %s485_s17 }
 0x8ad   : > { %s487_s1 = scalar_lea.vmem [#allocation2], %s1673_s26  ;;  %s2061_s26 = smov [#allocation2]  }
 0x8ae   : > { %s1607_s2 = sshll.u32 %s487_s1, 4  ;;  %s2427_s2 = int_to_ptr.vmem [resolvable:$true] %s1607_s2 }
 0x8af   : > { %1127 = vrot.lane.b32.xlu1 %v2235_v42, %s2058_s23  ;;  %s1984_s22 = scalar_lea.vmem %s2427_s2, 256 }
 0x8b0   : > { %p1985_p11 = scmp.ne.s32.totalorder %s2427_s2, %s1984_s22 }
 0x8b2   : > { %p1986_p12 = pnand %p1985_p11, %p2182_p5 }
 0x8b4   : > { %p1987_p13 = pneg %p1986_p12 }
 0x927   : > { %v1008_v7 = vpop.xlane.xlu1 %1007 }
 0x928   : > { %v1012_v8 = vsub.f32 %v999_v63, %v1008_v7 }
 0x929   : > { %v1011_v9 = vpop.xlane.xlu0 %1010 }
 0x92a   : > { %v1014_v10 = vmul.f32 1.442695, %v1012_v8  ;;  %v1013_v11 = vsub.f32 %v1002_v4, %v1011_v9 }
 0x92b   : > { %v1030_v12 = vpop.permute.xlu1 %1029 }
 0x92c   : > { %1956 = vpow2.f32 %v1014_v10  ;;  %v1016_v13 = vmul.f32 1.442695, %v1013_v11  ;;  %1813 = vmatpush3.bf16.msra.mxu0 %v1030_v12 }
 0x92d   : > { %1824 = vmatprep.subr.bf16.mxu0 %v2048_v16 }
 0x92e   : > { %1958 = vpow2.f32 %v1016_v13 }
 0x92f   : > { %v1128_v28 = vpop.permute.xlu1 %1127 }
 0x936   : > { %v1957_v14 = vpop.eup %1956 }
 0x937   : > { %v1018_v15 = vsel %vm664_vm3, %v1957_v14, 0.0 }
 0x938   : > { %v1959_v17 = vpop.eup %1958  ;;  %1019 = vadd.xlane.f32.xlu0 %v1018_v15 }
 0x939   : > { %v1021_v18 = vsel %vm664_vm3, %v1959_v17, 0.0 }
 0x93c   : > { %1022 = vadd.xlane.f32.xlu0 %v1021_v18 }
 0x952   : > { %1129 = vrot.lane.b32.xlu0 %v2235_v42, %s2059_s25  ;;  %s2425_s25 = scalar_lea.hbm %s2486_s15, %s1718_s0 }
 0x9c5   : > { %v1020_v19 = vpop.xlane.xlu0 %1019 }
 0x9c6   : > { %1960 = vrcp.f32 %v1020_v19 }
 0x9c9   : > { %v1023_v20 = vpop.xlane.xlu0 %1022 }
 0x9ca   : > { %1962 = vrcp.f32 %v1023_v20 }
 0x9cd   : > { %v1130_v25 = vpop.permute.xlu0 %1129 }
 0x9ce   : > { %v1135_v27 = vsel %vm616_vm2, %v1130_v25, 0 }
 0x9d0   : > { %v1961_v21 = vpop.eup %1960 }
 0x9d1   : > { %v1026_v23 = vmul.f32 %v1961_v21, %v1957_v14  ;;  %v1694_v14 = vld [vmem:[%s2477_s6] ss:$0 sm:$0xff] }
 0x9d4   : > { %v1963_v22 = vpop.eup %1962 }
 0x9d5   : > { %v1027_v24 = vmul.f32 %v1963_v22, %v1959_v17 }
 0x9d7   : > { %v1028_v26 = vpack.c.bf16 %v1027_v24, %v1026_v23 }
 0x9d9   : > { %1815 = vmatmul.mubr.msk.bf16.vlgmr.msra.gmra.mrb[8].mxu0 %vm664_vm3, %v1028_v26 }
 0x9da   : > { %1825 = vmatpush3.bf16.xpose.msra.mxu0 %v1135_v27  ;;  %1826 = vmatprep.mubr.msk.bf16.mxu0 %vm2049_vm1, %v2048_v16 }
 0x9db   : > { %1836 = vmatprep.subr.bf16.mxu0 %v2048_v16 }
 0x9e1   : > { %1827 = vmatmul.mubr.msk.bf16.vlgmr.msra.gmra.mrb[12].mxu0 %vm616_vm2, %v1128_v28 }
 0x9e2   : > { %1838 = vmatprep.mubr.msk.bf16.mxu0 %vm2049_vm1, %v2048_v16  ;;  %1837 = vmatpush3.bf16.msra.mxu0 %v1254_v54 }
 0x9e3   : > { %1850 = vmatprep.subr.bf16.mxu0 %v2048_v16 }
 0xaac   : > { %v1069_v31 = vpop.f32.mrb[8].mxu0 }
 0xaad   : > { %v1816_v32 = vpop.f32.mrb[9].mxu0 }
 0xaae   : > { %v1072_v33 = vpop.f32.mrb[10].mxu0 }
 0xaaf   : > { %v1076_v34 = vpack.c.bf16 %v1072_v33, %v1069_v31  ;;  %v1817_v35 = vpop.f32.mrb[11].mxu0  ;;  %v1926_v33 = vld [vmem:[%s2480_s9] sm:$0xff]  }
 0xab0   : > { %v1928_v35 = vld [vmem:[%s2482_s11] sm:$0xff]  }
 0xab1   : > { %1821 = vmatmul.mubr.msk.bf16.vlgmr.msra.gmra.mrb[24].mxu1 %vm616_vm2, %v1076_v34  ;;  %v1927_v34 = vld [vmem:[%s2480_s9 + $0x8] sm:$0xff]  }
 0xab2   : > { %1832 = vmatprep.mubr.msk.bf16.mxu1 %vm2049_vm1, %v2048_v16 }
 0xab4   : > { %v1171_v36 = vpop.f32.mrb[12].mxu0 }
 0xab5   : > { %v1828_v37 = vpop.f32.mrb[13].mxu0  ;;  %v1178_v38 = vsel %vm664_vm3, %v1171_v36, -inf }
 0xab6   : > { %1179 = vmax.xlane.f32.xlu1 %v1178_v38  ;;  %v1174_v39 = vpop.f32.mrb[14].mxu0 }
 0xab7   : > { %v1829_v40 = vpop.f32.mrb[15].mxu0  ;;  %v1181_v41 = vsel %vm664_vm3, %v1174_v39, -inf }
 0xab8   : > { %1182 = vmax.xlane.f32.xlu0 %v1181_v41 }
 0xb43   : > { %v1180_v43 = vpop.xlane.xlu1 %1179 }
 0xb44   : > { %v1184_v44 = vsub.f32 %v1171_v36, %v1180_v43  ;;  %v1929_v36 = vld [vmem:[%s2482_s11 + $0x8] sm:$0xff]  }
 0xb45   : > { %v1183_v45 = vpop.xlane.xlu0 %1182 }
 0xb46   : > { %v1186_v46 = vmul.f32 1.442695, %v1184_v44  ;;  %v1185_v47 = vsub.f32 %v1174_v39, %v1183_v45 }
 0xb48   : > { %1964 = vpow2.f32 %v1186_v46  ;;  %v1188_v48 = vmul.f32 1.442695, %v1185_v47  ;;  %v1695_v46 = vld [vmem:[%s2478_s7] ss:$0 sm:$0xff] }
 0xb4a   : > { %1966 = vpow2.f32 %v1188_v48 }
 0xb52   : > { %v1965_v49 = vpop.eup %1964 }
 0xb53   : > { %v1190_v50 = vsel %vm664_vm3, %v1965_v49, 0.0 }
 0xb54   : > { %v1967_v51 = vpop.eup %1966  ;;  %1191 = vadd.xlane.f32.xlu0 %v1190_v50  ;;  %v1696_v50 = vld [vmem:[%s2479_s8] ss:$0 sm:$0xff] }
 0xb55   : > { %v1193_v52 = vsel %vm664_vm3, %v1967_v51, 0.0 }
 0xb56   : > { %1194 = vadd.xlane.f32.xlu1 %v1193_v52 }
 0xb6a   : > { %1201 = vrot.lane.b32.xlu0 %v2235_v42, %s2060_s16  ;;  %s1988_s16 = sshll.u32 %s2061_s26, 4  ;;  %s1989_s16 = int_to_ptr.vmem [resolvable:$false] %s1988_s16 }
 0xb6b   : > { %s1990_s3 = scalar_lea.vmem %s1989_s16, 512  ;;  %p1991_p0 = scmp.lt.s32.totalorder %s2427_s2, %s1989_s16 }
 0xb6c   : > { %p1992_p1 = scmp.lt.s32.totalorder %s1990_s3, %s1984_s22 }
 0xb6e   : > { %p1993_p2 = por %p1992_p1, %p1991_p0 }
 0xb70   : > { %p1994_p3 = pnand %p1993_p2, %p1987_p13 }
 0xb84   : > { %v1118_v55 = vpop.f32.mrb[24].mxu1 }
 0xb85   : > { %v1125_v56 = vadd.f32 %v1118_v55, %v2292_v58  ;;  %v1822_v57 = vpop.f32.mrb[25].mxu1  ;;  %v1930_v55 = vld [vmem:[%s2482_s11 + $0x10] sm:$0xff]  }
 0xb86   : > { %v1121_v59 = vpop.f32.mrb[26].mxu1  ;;  %v1932_v57 = vld [vmem:[%s2482_s11 + $0x20] sm:$0xff]  }
 0xb87   : > { %v1126_v60 = vadd.f32 %v1121_v59, %v2294_v61  ;;  %v1823_v62 = vpop.f32.mrb[27].mxu1  ;;  %v1933_v59 = vld [vmem:[%s2482_s11 + $0x28] sm:$0xff]  }
 0xb88   : > { %v1935_v62 = vld [vmem:[%s2482_s11 + $0x38] sm:$0xff]  }
 0xbe1   : > { %v1192_v63 = vpop.xlane.xlu0 %1191 }
 0xbe2   : > { %1968 = vrcp.f32 %v1192_v63  ;;  %v1697_v63 = vld [vmem:[%s2481_s10] ss:$0 sm:$0xff] }
 0xbe3   : > { %v1195_v42 = vpop.xlane.xlu1 %1194 }
 0xbe4   : > { %1970 = vrcp.f32 %v1195_v42 }
 0xbe5   : > { %v1202_v0 = vpop.permute.xlu0 %1201 }
 0xbe6   : > { %1831 = vmatpush3.bf16.msra.mxu1 %v1202_v0 }
 0xbe7   : > { %1842 = vmatprep.subr.bf16.mxu1 %v2048_v16 }
 0xbec   : > { %v1969_v3 = vpop.eup %1968 }
 0xbed   : > { %v1198_v5 = vmul.f32 %v1969_v3, %v1965_v49 }
 0xbee   : > { %v1971_v4 = vpop.eup %1970 }
 0xbef   : > { %v1199_v6 = vmul.f32 %v1971_v4, %v1967_v51 }
 0xbf1   : > { %v1200_v7 = vpack.c.bf16 %v1199_v6, %v1198_v5 }
 0xbf3   : > { %1833 = vmatmul.mubr.msk.bf16.vlgmr.msra.gmra.mrb[28].mxu1 %vm664_vm3, %v1200_v7 }
 0xbf4   : > { %1846 = vmatprep.mubr.msk.bf16.mxu1 %vm2049_vm1, %v2048_v16  ;;  %1843 = vmatpush3.bf16.msra.mxu1 %v1926_v33 }
 0xbf5   : > { %1844 = vmatprep.subr.bf16.mxu1 %v2048_v16 }
 0xbf8   : > { %1845 = vmatpush3.bf16.msra.mxu1 %v1927_v34 }
 0xcc6   : > { %v1241_v58 = vpop.f32.mrb[28].mxu1 }
 0xcc7   : > { %v1834_v61 = vpop.f32.mrb[29].mxu1 }
 0xcc8   : > { %v1244_v8 = vpop.f32.mrb[30].mxu1 }
 0xcc9   : > { %v1248_v9 = vpack.c.bf16 %v1244_v8, %v1241_v58  ;;  %v1835_v10 = vpop.f32.mrb[31].mxu1 }
 0xccb   : > { %1839 = vmatmul.mubr.msk.bf16.vlgmr.msra.gmra.mrb[16].mxu0 %vm616_vm2, %v1248_v9 }
 0xccc   : > { %1866 = vmatprep.mubr.msk.bf16.mxu0 %vm2049_vm1, %v2048_v16  ;;  %1851 = vmatpush3.bf16.msra.mxu0 %v1928_v35 }
 0xccd   : > { %1852 = vmatprep.subr.bf16.mxu0 %v2048_v16 }
 0xcd0   : > { %1853 = vmatpush3.bf16.msra.mxu0 %v1929_v36 }
 0xcd1   : > { %1854 = vmatprep.subr.bf16.mxu0 %v2048_v16 }
 0xcd4   : > { %1855 = vmatpush3.bf16.msra.mxu0 %v1930_v55 }
 0xcd5   : > { %1856 = vmatprep.subr.bf16.mxu0 %v2048_v16 }
 0xd9e   : > { %v1290_v11 = vpop.f32.mrb[16].mxu0 }
 0xd9f   : > { %v1297_v12 = vadd.f32 %v1290_v11, %v1125_v56  ;;  %v1840_v13 = vpop.f32.mrb[17].mxu0  ;;  %v1931_v56 = vld [vmem:[%s2482_s11 + $0x18] sm:$0xff]  }
 0xda0   : > { %v1293_v15 = vpop.f32.mrb[18].mxu0  ;;  %1857 = vmatpush3.bf16.msra.mxu0 %v1931_v56 }
 0xda1   : > { %v1299_v17 = vadd.f32 %v2197_v1, %v1297_v12  ;;  %v1298_v18 = vadd.f32 %v1293_v15, %v1126_v60  ;;  %v1841_v19 = vpop.f32.mrb[19].mxu0  ;;  %1858 = vmatprep.subr.bf16.mxu0 %v2048_v16  ;;  %v1934_v60 = vld [vmem:[%s2482_s11 + $0x30] sm:$0xff]   ;;  %v1701_v15 = vld [vmem:[%s2483_s12] ss:$0 sm:$0xff] }
 0xda3   : > { %v2343_v20 = vadd.f32 %v1694_v14, %v1299_v17  ;;  %v1300_v21 = vadd.f32 %v2199_v2, %v1298_v18 }
 0xda4   : > { %1859 = vmatpush3.bf16.msra.mxu0 %v1932_v57 }
 0xda5   : > { %v2346_v22 = vadd.f32 %v1694_v14, %v1300_v21  ;;  %v1312_v23 = vsel %vm500_vm0, %v2343_v20, 0.0  ;;  %1860 = vmatprep.subr.bf16.mxu0 %v2048_v16 }
 0xda6   : > { %1313 = vadd.xlane.f32.xlu1 %v1312_v23 }
 0xda7   : > { %v1315_v24 = vsel %vm500_vm0, %v2346_v22, 0.0 }
 0xda8   : > { %1861 = vmatpush3.bf16.msra.mxu0 %v1933_v59 }
 0xda9   : > { %1862 = vmatprep.subr.bf16.mxu0 %v2048_v16 }
 0xdaa   : > { %1316 = vadd.xlane.f32.xlu1 %v1315_v24 }
 0xdac   : > { %1863 = vmatpush3.bf16.msra.mxu0 %v1934_v60 }
 0xdad   : > { %1864 = vmatprep.subr.bf16.mxu0 %v2048_v16 }
 0xdb0   : > { %1865 = vmatpush3.bf16.msra.mxu0 %v1935_v62 }
 0xe33   : > { %v1314_v25 = vpop.xlane.xlu1 %1313 }
 0xe34   : > { %v1318_v26 = vmul.f32 0.03125, %v1314_v25 }
 0xe36   : > { %v1320_v1 = vsub.f32 %v2343_v20, %v1318_v26 }
 0xe37   : > { %v1317_v27 = vpop.xlane.xlu1 %1316 }
 0xe38   : > { %v1319_v28 = vmul.f32 0.03125, %v1317_v27  ;;  %v1322_v29 = vmul.f32 %v1320_v1, %v1320_v1 }
 0xe3a   : > { %v1321_v30 = vsub.f32 %v2346_v22, %v1319_v28  ;;  %v1324_v2 = vsel %vm500_vm0, %v1322_v29, 0.0 }
 0xe3b   : > { %1325 = vadd.xlane.f32.xlu1 %v1324_v2 }
 0xe3c   : > { %v1323_v31 = vmul.f32 %v1321_v30, %v1321_v30 }
 0xe3e   : > { %v1327_v32 = vsel %vm500_vm0, %v1323_v31, 0.0 }
 0xe3f   : > { %1328 = vadd.xlane.f32.xlu1 %v1327_v32 }
 0xec8   : > { %v1326_v37 = vpop.xlane.xlu1 %1325 }
 0xec9   : > { %v1330_v38 = vmul.f32 0.03125, %v1326_v37 }
 0xecb   : > { %v1332_v39 = vadd.f32 1e-05, %v1330_v38 }
 0xecc   : > { %v1329_v40 = vpop.xlane.xlu1 %1328 }
 0xecd   : > { %1972 = vrsqrt.f32 %v1332_v39  ;;  %v1331_v41 = vmul.f32 0.03125, %v1329_v40 }
 0xecf   : > { %v1333_v43 = vadd.f32 1e-05, %v1331_v41 }
 0xed1   : > { %1974 = vrsqrt.f32 %v1333_v43  ;;  %v1710_v43 = vld [vmem:[%s2484_s13] ss:$0 sm:$0xff] }
 0xed7   : > { %v1973_v44 = vpop.eup %1972 }
 0xed8   : > { %v1336_v45 = vmul.f32 %v1973_v44, %v1320_v1 }
 0xeda   : > { %v1344_v48 = vmul.f32 %v1695_v46, %v1336_v45  ;;  %v1711_v45 = vld [vmem:[%s2485_s14] ss:$0 sm:$0xff] }
 0xedb   : > { %v1975_v47 = vpop.eup %1974 }
 0xedc   : > { %v1337_v49 = vmul.f32 %v1975_v47, %v1321_v30  ;;  %v1352_v52 = vadd.f32 %v1696_v50, %v1344_v48 }
 0xede   : > { %v1345_v51 = vmul.f32 %v1695_v46, %v1337_v49 }
 0xee0   : > { %v1353_v53 = vadd.f32 %v1696_v50, %v1345_v51 }
 0xee2   : > { %v1354_v54 = vpack.c.bf16 %v1353_v53, %v1352_v52 }
 0xee4   : > { %1847 = vmatmul.mubr.msk.bf16.vlgmr.msra.gmra.mrb[32].mxu1 %vm500_vm0, %v1354_v54 }
 0xfb7   : > { %v1415_v42 = vpop.f32.mrb[32].mxu1 }
 0xfb8   : > { %v1416_v0 = vadd.f32 %v1697_v63, %v1415_v42  ;;  %v1848_v3 = vpop.f32.mrb[33].mxu1 }
 0xfb9   : > { %v1418_v4 = vpop.f32.mrb[34].mxu1 }
 0xfba   : > { %v1424_v5 = vmul.f32 0.70710677, %v1416_v0  ;;  %v1419_v6 = vadd.f32 %v1697_v63, %v1418_v4  ;;  %v1849_v7 = vpop.f32.mrb[35].mxu1  ;;  %v1422_v9 = vmul.f32 0.5, %v1416_v0 }
 0xfbc   : > { %1976 = verf.f32 %v1424_v5  ;;  %v1425_v58 = vmul.f32 0.70710677, %v1419_v6  ;;  %v1423_v10 = vmul.f32 0.5, %v1419_v6 }
 0xfbe   : > { %1978 = verf.f32 %v1425_v58 }
 0xfc6   : > { %v1977_v16 = vpop.eup %1976 }
 0xfc7   : > { %v1428_v61 = vadd.f32 1.0, %v1977_v16 }
 0xfc8   : > { %v1979_v8 = vpop.eup %1978 }
 0xfc9   : > { %v1429_v11 = vadd.f32 1.0, %v1979_v8  ;;  %v1430_v12 = vmul.f32 %v1428_v61, %v1422_v9 }
 0xfcb   : > { %v1431_v13 = vmul.f32 %v1429_v11, %v1423_v10 }
 0xfcd   : > { %v1432_v14 = vpack.c.bf16 %v1431_v13, %v1430_v12 }
 0xfcf   : > { %1867 = vmatmul.mubr.bf16.vlgmr.msra.gmra.mrb[20].mxu0 %v1432_v14 }
0x10a2   : > { %v1538_v17 = vpop.f32.mrb[20].mxu0 }
0x10a3   : > { %v1539_v18 = vadd.f32 %v1701_v15, %v1538_v17  ;;  %v1868_v19 = vpop.f32.mrb[21].mxu0 }
0x10a4   : > { %v1541_v21 = vpop.f32.mrb[22].mxu0 }
0x10a5   : > { %v1542_v23 = vadd.f32 %v1701_v15, %v1541_v21  ;;  %v1869_v24 = vpop.f32.mrb[23].mxu0  ;;  %v1545_v25 = vadd.f32 %v1539_v18, %v2343_v20 }
0x10a7   : > { %v1549_v26 = vsel %vm500_vm0, %v1545_v25, 0.0  ;;  %v1546_v1 = vadd.f32 %v1542_v23, %v2346_v22 }
0x10a8   : > { %1550 = vadd.xlane.f32.xlu1 %v1549_v26 }
0x10a9   : > { %v1552_v27 = vsel %vm500_vm0, %v1546_v1, 0.0 }
0x10ac   : > { %1553 = vadd.xlane.f32.xlu1 %v1552_v27 }
0x1135   : > { %v1551_v28 = vpop.xlane.xlu1 %1550 }
0x1136   : > { %v1555_v29 = vmul.f32 0.03125, %v1551_v28 }
0x1138   : > { %v1557_v30 = vsub.f32 %v1545_v25, %v1555_v29 }
0x1139   : > { %v1554_v2 = vpop.xlane.xlu1 %1553 }
0x113a   : > { %v1556_v31 = vmul.f32 0.03125, %v1554_v2  ;;  %v1559_v32 = vmul.f32 %v1557_v30, %v1557_v30 }
0x113c   : > { %v1558_v33 = vsub.f32 %v1546_v1, %v1556_v31  ;;  %v1561_v34 = vsel %vm500_vm0, %v1559_v32, 0.0 }
0x113d   : > { %1562 = vadd.xlane.f32.xlu0 %v1561_v34 }
0x113e   : > { %v1560_v20 = vmul.f32 %v1558_v33, %v1558_v33 }
0x1140   : > { %v1564_v35 = vsel %vm500_vm0, %v1560_v20, 0.0 }
0x1141   : > { %1565 = vadd.xlane.f32.xlu1 %v1564_v35 }
0x11ca   : > { %v1563_v22 = vpop.xlane.xlu0 %1562 }
0x11cb   : > { %v1567_v36 = vmul.f32 0.03125, %v1563_v22 }
0x11cd   : > { %v1569_v37 = vadd.f32 1e-05, %v1567_v36 }
0x11ce   : > { %v1566_v38 = vpop.xlane.xlu1 %1565 }
0x11cf   : > { %1980 = vrsqrt.f32 %v1569_v37  ;;  %v1568_v39 = vmul.f32 0.03125, %v1566_v38 }
0x11d1   : > { %v1570_v40 = vadd.f32 1e-05, %v1568_v39 }
0x11d3   : > { %1982 = vrsqrt.f32 %v1570_v40 }
0x11d9   : > { %v1981_v41 = vpop.eup %1980 }
0x11da   : > { %v1573_v44 = vmul.f32 %v1981_v41, %v1557_v30 }
0x11dc   : > { %v1581_v46 = vmul.f32 %v1710_v43, %v1573_v44 }
0x11dd   : > { %v1983_v47 = vpop.eup %1982 }
0x11de   : > { %v1589_v48 = vadd.f32 %v1711_v45, %v1581_v46  ;;  %v1574_v49 = vmul.f32 %v1983_v47, %v1558_v33 }
0x11e0   : > { %v1582_v50 = vmul.f32 %v1710_v43, %v1574_v49  ;;  %1591 = vst.msk [vmem:[%s487_s1] sm:$0xff] %vm500_vm0, %v1589_v48 }
0x11e2   : > { %v1590_v51 = vadd.f32 %v1711_v45, %v1582_v50 }
0x11e4   : > { %1592 = vst.msk [vmem:[%s487_s1 + $0x8] sm:$0xff] %vm500_vm0, %v1590_v51 }
0x11e5   : > { %1997 = shalt.err (!%p1994_p3)
}
0x11e6   : > { %s1998_s17 = scalar_lea.hbm %s2425_s25, 256  ;;  %s2002_s23 = scalar_lea.hbm %s2486_s15, 512 }
0x11e7   : > { %p1999_p4 = scmp.ne.s32.totalorder %s2425_s25, %s1998_s17  ;;  %p2003_p9 = scmp.lt.u32.totalorder %s2425_s25, %s2486_s15 }
0x11e8   : > { %p2004_p10 = scmp.lt.u32.totalorder %s2002_s23, %s1998_s17  ;;  %p2006_p12 = scmp.lt.u32.totalorder %s1998_s17, %s2425_s25 }
0x11e9   : > { %p2000_p7 = pnand %p1999_p4, %p2182_p5 }
0x11ea   : > { %p2005_p11 = por %p2004_p10, %p2003_p9 }
0x11eb   : > { %p2001_p8 = pneg %p2000_p7 }
0x11ec   : > { %p2007_p13 = por %p2006_p12, %p2005_p11 }
0x11ee   : > { %p2008_p0 = pnand %p2007_p13, %p2001_p8 }
0x11f0   : > { %2011 = shalt.err (!%p2008_p0)
}
0x11f1   : > { %s2062_s22 = smov 128   ;;  %s2063_s3 = smov 8  }
0x11f2   : > { %1870 = dma.vmem_to_hbm [thread:$0]  (%p2182_p5), %s2427_s2, 256, %s2425_s25, %s2430_s30, %s2062_s22, %s2062_s22, %s2063_s3  }
0x11f3 PF: > { %p1876_p1 = scmp.ge.s32.totalorder %s2046_s21, 2  ;;  %s1622_s0 = sand.u32 1, %s2034_s18  }
0x11f4   : > { %s1623_s17 = scalar_lea.sflag [#allocation3], %s1622_s0 }
0x11f5   : > { %p1873_p2 = pnand %p1876_p1, %p2186_p6 }
0x11f7   : > { %2029 = dma.done.wait (!%p1873_p2), %s1623_s17, 256  }
0x11f8   : > { %2031 = vsyncadd (!%p1873_p2), %s1623_s17, 4294967040  ;;  %p25_p3 = scmp.ge.s32.totalorder %s2169_s24, 4   ;;  %s2497_s18 = smov %s2038_s19 }
0x11f9   : > { %s2498_s19 = smov %s2042_s20  ;;  %s2499_s20 = smov %s2180_s27 }
0x11fa   : > { %s2500_s21 = smov %s2169_s24  ;;  %27 = sbr.rel (!%p25_p3) target bundleno = 8 (0x8), region = 115 }
0x1201   :  { %1628 = vsyncpa [#allocation3], 1 }
0x1202   :  { %1630 = vsyncpa [#allocation3 + $0x1], 1 }

</bundles_post_ra>
